<compile_context>
chip_gen: v7x
topology: tpu7x:2x2x1
jax: 0.10.0
libtpu: 0.0.40
codegen_flags: <defaults>
</compile_context>

<pallas_src>
import numpy as np
import jax
import jax.numpy as jnp
from jax import lax
from jax.experimental import pallas as pl
from jax.experimental.pallas import tpu as pltpu


# ----------------------------- Pallas kernel -------------------------------

def _make_decoder_kernel(H, W, N):
    HW = H * W
    NHW = N * HW
    assert (H & (H - 1)) == 0 and (W & (W - 1)) == 0, (
        "in-kernel mask generation assumes power-of-two H, W")
    log2w = W.bit_length() - 1

    def kernel(idx_ref, cb_t_ref, w1_ref, b1_ref, w2_ref, b2_ref, out_ref):
        """Single-shot kernel (no grid).

        idx_ref  : (1, NHW)   int32  latent codes, lane-resident
        cb_t_ref : (E, K)     f32    codebook, transposed
        w1_ref   : (C1, 9*E)  bf16   conv1 weights, im2col layout
        b1_ref   : (C1, 1)    f32
        w2_ref   : (CO, 9*C1) bf16   conv2 weights, im2col layout
        b2_ref   : (CO, 1)    f32
        out_ref  : (CO, NHW)  f32    reconstruction (channels-first, flat)
        """
        K = cb_t_ref.shape[1]

        idx = idx_ref[...]                                    # (1, NHW) int32

        # --- per-tap zero-padding validity masks, generated in-kernel --------
        # pos = n*H*W + y*W + x ; x = pos & (W-1), y = (pos >> log2W) & (H-1).
        pos = lax.broadcasted_iota(jnp.int32, (1, NHW), 1)
        xq = pos & (W - 1)
        yq = (pos >> log2w) & (H - 1)
        y_ok = {-1: yq >= 1, 0: None, 1: yq <= H - 2}
        x_ok = {-1: xq >= 1, 0: None, 1: xq <= W - 2}
        tap_mask = {}                                          # hoisted once,
        for dy in (-1, 0, 1):                                  # reused by both
            for dx in (-1, 0, 1):                              # convs
                if dy == 0 and dx == 0:
                    continue
                v = y_ok[dy]
                if x_ok[dx] is not None:
                    v = x_ok[dx] if v is None else (v & x_ok[dx])
                tap_mask[(dy, dx)] = v.astype(jnp.float32)     # (1, NHW)

        # --- codebook lookup: (E, K) @ one_hot(K, NHW) -> (E, NHW) ----------
        # HIGHEST precision keeps the gathered embeddings exact in f32 (K=16).
        iota_k = lax.broadcasted_iota(jnp.int32, (K, NHW), 0)
        onehot = (iota_k == idx).astype(jnp.float32)           # (K, NHW)
        e_t = jnp.dot(cb_t_ref[...], onehot,
                      preferred_element_type=jnp.float32,
                      precision=lax.Precision.HIGHEST)         # (E, NHW)

        def im2col_bf16(feat):
            # feat: (C, NHW) f32 -> (9*C, NHW) bf16. 8 masked lane-rotations
            # plus the center tap, stacked along sublanes.  Rotation wrap
            # across image/batch boundaries is killed by the validity masks
            # (any cross-image read coincides with out-of-bounds y/x).
            cols = []
            for dy in (-1, 0, 1):
                for dx in (-1, 0, 1):
                    off = dy * W + dx
                    if off == 0:
                        cols.append(feat)                      # center tap
                    else:
                        shifted = pltpu.roll(feat, (-off) % NHW, 1)
                        cols.append(shifted * tap_mask[(dy, dx)])   # f32 VPU
            return jnp.concatenate(cols, axis=0).astype(jnp.bfloat16)

        # --- conv1 (3x3 SAME) as one fused bf16 matmul, + f32 bias + ReLU ----
        h = jnp.dot(w1_ref[...], im2col_bf16(e_t),
                    preferred_element_type=jnp.float32)        # (C1, NHW) f32
        h = jnp.maximum(h + b1_ref[...], 0.0)

        # --- conv2 (3x3 SAME) as one fused bf16 matmul, + f32 bias -----------
        o = jnp.dot(w2_ref[...], im2col_bf16(h),
                    preferred_element_type=jnp.float32)        # (CO, NHW) f32
        out_ref[...] = o + b2_ref[...]                         # lane-dense vst

    return kernel


# ------------------------------ Wrapper -------------------------------------

@jax.jit
def decoder_pathway_forward(latents, codebook, w1_hwio, b1, w2_hwio, b2):
    """latents: [N, H, W] int codes.  Returns i_r in NCHW: [N, C_OUT, H, W]."""
    N, H, W = latents.shape
    HW = H * W
    NHW = N * HW
    K, E = codebook.shape
    C1 = w1_hwio.shape[-1]
    CO = w2_hwio.shape[-1]

    # All of this prep is inside the jit -> traced once, fused by XLA.
    idx = latents.reshape(1, NHW).astype(jnp.int32)            # lane-resident
    cb_t = jnp.transpose(codebook)                             # (E, K) f32
    # im2col weight layout: wf[c_out, t*C_in + c_in] = w_hwio[ky, kx, c_in, c_out]
    w1f = jnp.transpose(w1_hwio.reshape(9, E, C1), (2, 0, 1)).reshape(C1, 9 * E)
    w2f = jnp.transpose(w2_hwio.reshape(9, C1, CO), (2, 0, 1)).reshape(CO, 9 * C1)
    w1f = w1f.astype(jnp.bfloat16)                             # halves weight DMA
    w2f = w2f.astype(jnp.bfloat16)
    b1c = b1.reshape(C1, 1).astype(jnp.float32)
    b2c = b2.reshape(CO, 1).astype(jnp.float32)

    flops = 2 * (E * K + C1 * 9 * E + CO * 9 * C1) * NHW
    bytes_accessed = (idx.size * 4 + cb_t.size * 4 + w1f.size * 2 +
                      b1c.size * 4 + w2f.size * 2 + b2c.size * 4 +
                      CO * NHW * 4)
    cost = pl.CostEstimate(flops=flops, transcendentals=0,
                           bytes_accessed=bytes_accessed)

    vmem = lambda: pl.BlockSpec(memory_space=pltpu.MemorySpace.VMEM)

    # Single gridless call: all operands are tiny (few KB) and fit VMEM on
    # v5e/v6e/v7x; the grid is a sequential loop on one TensorCore, so there
    # is nothing to gain from splitting a 256-lane problem.
    out_t = pl.pallas_call(
        _make_decoder_kernel(H, W, N),
        out_shape=jax.ShapeDtypeStruct((CO, NHW), jnp.float32),
        in_specs=[vmem() for _ in range(6)],
        out_specs=vmem(),
        cost_estimate=cost,
    )(idx, cb_t, w1f, b1c, w2f, b2c)

    # (CO, N*H*W) -> NCHW, matching the PyTorch Conv2d output convention.
    return jnp.transpose(out_t.reshape(CO, N, H, W), (1, 0, 2, 3))


# --------------------------- Pure-JAX reference ------------------------------

def reference_forward(latents, codebook, w1_hwio, b1, w2_hwio, b2):
    N, H, W = latents.shape
    e = jnp.take(codebook, latents.reshape(N, -1), axis=0).reshape(N, H, W, -1)
    h = jax.lax.conv_general_dilated(
        e, w1_hwio, (1, 1), "SAME",
        dimension_numbers=("NHWC", "HWIO", "NHWC"))
    h = jax.nn.relu(h + b1)
    o = jax.lax.conv_general_dilated(
        h, w2_hwio, (1, 1), "SAME",
        dimension_numbers=("NHWC", "HWIO", "NHWC"))
    o = o + b2
    return jnp.transpose(o, (0, 3, 1, 2))                      # NCHW


# --------------------------------- Main --------------------------------------

if __name__ == "__main__":
    # Small shapes consistent with the module's forward ([N][H][W] latent codes).
    # N*H*W = 256 = one full 256-wide MXU lane sweep on v6e/v7x.
    N, H, W = 4, 8, 8      # latent grid
    K, E = 16, 32          # codebook: num codes, embedding dim
    C1, C_OUT = 32, 4      # decoder hidden channels, output image channels

    key = jax.random.PRNGKey(0)
    k_lat, k_cb, k_w1, k_b1, k_w2, k_b2 = jax.random.split(key, 6)

    latents = jax.random.randint(k_lat, (N, H, W), 0, K, dtype=jnp.int32)
    codebook = 0.1 * jax.random.normal(k_cb, (K, E), jnp.float32)
    w1_hwio = (jax.random.normal(k_w1, (3, 3, E, C1), jnp.float32)
               / np.sqrt(9 * E))
    b1 = 0.01 * jax.random.normal(k_b1, (C1,), jnp.float32)
    w2_hwio = (jax.random.normal(k_w2, (3, 3, C1, C_OUT), jnp.float32)
               / np.sqrt(9 * C1))
    b2 = 0.01 * jax.random.normal(k_b2, (C_OUT,), jnp.float32)

    i_r = decoder_pathway_forward(latents, codebook, w1_hwio, b1, w2_hwio, b2)
    i_r = jax.block_until_ready(i_r)

    ref = reference_forward(latents, codebook, w1_hwio, b1, w2_hwio, b2)
    ref = jax.block_until_ready(ref)

    assert i_r.shape == (N, C_OUT, H, W), i_r.shape
    # bf16 conv-matmul operands (f32 accumulation) leave ~1e-3-level residual
    # vs the f32 XLA conv reference; 1e-2 absorbs it comfortably.
    assert np.allclose(np.asarray(i_r), np.asarray(ref), atol=1e-2, rtol=1e-2), (
        "max abs diff %g" % float(np.max(np.abs(np.asarray(i_r) - np.asarray(ref)))))

    print("KERNEL_OK")
</pallas_src>

<mosaic_0001>
module attributes {stable_mosaic.version = 11 : i64} {
  func.func @kernel(%arg0: memref<1x256xi32, #tpu.memory_space<vmem>>, %arg1: memref<32x16xf32, #tpu.memory_space<vmem>>, %arg2: memref<32x288xbf16, #tpu.memory_space<vmem>>, %arg3: memref<32x1xf32, #tpu.memory_space<vmem>>, %arg4: memref<4x288xbf16, #tpu.memory_space<vmem>>, %arg5: memref<4x1xf32, #tpu.memory_space<vmem>>, %arg6: memref<4x256xf32, #tpu.memory_space<vmem>>) attributes {dimension_semantics = [], scalar_prefetch = 0 : i64, scratch_operands = 0 : i64, tpu.core_type = #tpu.core_type<tc>} {
    %c0 = arith.constant 0 : index
    %c0_0 = arith.constant 0 : index
    %0 = vector.load %arg0[%c0, %c0_0] : memref<1x256xi32, #tpu.memory_space<vmem>>, vector<1x256xi32>
    %1 = tpu.iota {dimensions = array<i32: 1>} : vector<1x256xi32>
    %c7_i32 = arith.constant 7 : i32
    %2 = vector.broadcast %c7_i32 : i32 to vector<1x256xi32>
    %3 = arith.andi %1, %2 : vector<1x256xi32>
    %c3_i32 = arith.constant 3 : i32
    %4 = vector.broadcast %c3_i32 : i32 to vector<1x256xi32>
    %5 = arith.shrsi %1, %4 : vector<1x256xi32>
    %c7_i32_1 = arith.constant 7 : i32
    %6 = vector.broadcast %c7_i32_1 : i32 to vector<1x256xi32>
    %7 = arith.andi %5, %6 : vector<1x256xi32>
    %c1_i32 = arith.constant 1 : i32
    %8 = vector.broadcast %c1_i32 : i32 to vector<1x256xi32>
    %9 = arith.cmpi sge, %7, %8 : vector<1x256xi32>
    %c6_i32 = arith.constant 6 : i32
    %10 = vector.broadcast %c6_i32 : i32 to vector<1x256xi32>
    %11 = arith.cmpi sle, %7, %10 : vector<1x256xi32>
    %c1_i32_2 = arith.constant 1 : i32
    %12 = vector.broadcast %c1_i32_2 : i32 to vector<1x256xi32>
    %13 = arith.cmpi sge, %3, %12 : vector<1x256xi32>
    %c6_i32_3 = arith.constant 6 : i32
    %14 = vector.broadcast %c6_i32_3 : i32 to vector<1x256xi32>
    %15 = arith.cmpi sle, %3, %14 : vector<1x256xi32>
    %16 = arith.andi %9, %13 : vector<1x256xi1>
    %17 = arith.extui %16 : vector<1x256xi1> to vector<1x256xi32>
    %18 = arith.sitofp %17 : vector<1x256xi32> to vector<1x256xf32>
    %19 = arith.extui %9 : vector<1x256xi1> to vector<1x256xi32>
    %20 = arith.sitofp %19 : vector<1x256xi32> to vector<1x256xf32>
    %21 = arith.andi %9, %15 : vector<1x256xi1>
    %22 = arith.extui %21 : vector<1x256xi1> to vector<1x256xi32>
    %23 = arith.sitofp %22 : vector<1x256xi32> to vector<1x256xf32>
    %24 = arith.extui %13 : vector<1x256xi1> to vector<1x256xi32>
    %25 = arith.sitofp %24 : vector<1x256xi32> to vector<1x256xf32>
    %26 = arith.extui %15 : vector<1x256xi1> to vector<1x256xi32>
    %27 = arith.sitofp %26 : vector<1x256xi32> to vector<1x256xf32>
    %28 = arith.andi %11, %13 : vector<1x256xi1>
    %29 = arith.extui %28 : vector<1x256xi1> to vector<1x256xi32>
    %30 = arith.sitofp %29 : vector<1x256xi32> to vector<1x256xf32>
    %31 = arith.extui %11 : vector<1x256xi1> to vector<1x256xi32>
    %32 = arith.sitofp %31 : vector<1x256xi32> to vector<1x256xf32>
    %33 = arith.andi %11, %15 : vector<1x256xi1>
    %34 = arith.extui %33 : vector<1x256xi1> to vector<1x256xi32>
    %35 = arith.sitofp %34 : vector<1x256xi32> to vector<1x256xf32>
    %36 = tpu.iota {dimensions = array<i32: 0>} : vector<16x256xi32>
    %37 = vector.broadcast %0 : vector<1x256xi32> to vector<16x256xi32>
    %38 = arith.cmpi eq, %36, %37 : vector<16x256xi32>
    %39 = arith.extui %38 : vector<16x256xi1> to vector<16x256xi32>
    %40 = arith.sitofp %39 : vector<16x256xi32> to vector<16x256xf32>
    %c0_4 = arith.constant 0 : index
    %c0_5 = arith.constant 0 : index
    %41 = vector.load %arg1[%c0_4, %c0_5] : memref<32x16xf32, #tpu.memory_space<vmem>>, vector<32x16xf32>
    %cst = arith.constant dense<0.000000e+00> : vector<32x256xf32>
    %42 = tpu.matmul %41, %40, %cst {dimension_numbers = #tpu.dot_dimension_numbers<[1], [0], [0], [1], [0, 0, 1, 1], [], []>, precision = #tpu.contract_precision<fp32>} : vector<32x16xf32>, vector<16x256xf32>, vector<32x256xf32> -> vector<32x256xf32>
    %c0_6 = arith.constant 0 : index
    %c0_7 = arith.constant 0 : index
    %43 = vector.load %arg2[%c0_6, %c0_7] : memref<32x288xbf16, #tpu.memory_space<vmem>>, vector<32x288xbf16>
    %c9_i32 = arith.constant 9 : i32
    %44 = tpu.dynamic_rotate %42 by %c9_i32 dim 1 : vector<32x256xf32>, i32 -> vector<32x256xf32>
    %45 = vector.broadcast %18 : vector<1x256xf32> to vector<32x256xf32>
    %46 = arith.mulf %44, %45 : vector<32x256xf32>
    %c8_i32 = arith.constant 8 : i32
    %47 = tpu.dynamic_rotate %42 by %c8_i32 dim 1 : vector<32x256xf32>, i32 -> vector<32x256xf32>
    %48 = vector.broadcast %20 : vector<1x256xf32> to vector<32x256xf32>
    %49 = arith.mulf %47, %48 : vector<32x256xf32>
    %c7_i32_8 = arith.constant 7 : i32
    %50 = tpu.dynamic_rotate %42 by %c7_i32_8 dim 1 : vector<32x256xf32>, i32 -> vector<32x256xf32>
    %51 = vector.broadcast %23 : vector<1x256xf32> to vector<32x256xf32>
    %52 = arith.mulf %50, %51 : vector<32x256xf32>
    %c1_i32_9 = arith.constant 1 : i32
    %53 = tpu.dynamic_rotate %42 by %c1_i32_9 dim 1 : vector<32x256xf32>, i32 -> vector<32x256xf32>
    %54 = vector.broadcast %25 : vector<1x256xf32> to vector<32x256xf32>
    %55 = arith.mulf %53, %54 : vector<32x256xf32>
    %c255_i32 = arith.constant 255 : i32
    %56 = tpu.dynamic_rotate %42 by %c255_i32 dim 1 : vector<32x256xf32>, i32 -> vector<32x256xf32>
    %57 = vector.broadcast %27 : vector<1x256xf32> to vector<32x256xf32>
    %58 = arith.mulf %56, %57 : vector<32x256xf32>
    %c249_i32 = arith.constant 249 : i32
    %59 = tpu.dynamic_rotate %42 by %c249_i32 dim 1 : vector<32x256xf32>, i32 -> vector<32x256xf32>
    %60 = vector.broadcast %30 : vector<1x256xf32> to vector<32x256xf32>
    %61 = arith.mulf %59, %60 : vector<32x256xf32>
    %c248_i32 = arith.constant 248 : i32
    %62 = tpu.dynamic_rotate %42 by %c248_i32 dim 1 : vector<32x256xf32>, i32 -> vector<32x256xf32>
    %63 = vector.broadcast %32 : vector<1x256xf32> to vector<32x256xf32>
    %64 = arith.mulf %62, %63 : vector<32x256xf32>
    %c247_i32 = arith.constant 247 : i32
    %65 = tpu.dynamic_rotate %42 by %c247_i32 dim 1 : vector<32x256xf32>, i32 -> vector<32x256xf32>
    %66 = vector.broadcast %35 : vector<1x256xf32> to vector<32x256xf32>
    %67 = arith.mulf %65, %66 : vector<32x256xf32>
    %68 = tpu.concatenate %46, %49, %52, %55, %42, %58, %61, %64, %67 in 0 : vector<32x256xf32>, vector<32x256xf32>, vector<32x256xf32>, vector<32x256xf32>, vector<32x256xf32>, vector<32x256xf32>, vector<32x256xf32>, vector<32x256xf32>, vector<32x256xf32> -> vector<288x256xf32>
    %69 = arith.truncf %68 : vector<288x256xf32> to vector<288x256xbf16>
    %cst_10 = arith.constant dense<0.000000e+00> : vector<32x256xf32>
    %70 = tpu.matmul %43, %69, %cst_10 {dimension_numbers = #tpu.dot_dimension_numbers<[1], [0], [0], [1], [0, 0, 1, 1], [], []>} : vector<32x288xbf16>, vector<288x256xbf16>, vector<32x256xf32> -> vector<32x256xf32>
    %c0_11 = arith.constant 0 : index
    %c0_12 = arith.constant 0 : index
    %71 = vector.load %arg3[%c0_11, %c0_12] : memref<32x1xf32, #tpu.memory_space<vmem>>, vector<32x1xf32>
    %72 = vector.broadcast %71 : vector<32x1xf32> to vector<32x256xf32>
    %73 = arith.addf %70, %72 : vector<32x256xf32>
    %cst_13 = arith.constant 0.000000e+00 : f32
    %74 = vector.broadcast %cst_13 : f32 to vector<32x256xf32>
    %75 = arith.maximumf %73, %74 : vector<32x256xf32>
    %c0_14 = arith.constant 0 : index
    %c0_15 = arith.constant 0 : index
    %76 = vector.load %arg4[%c0_14, %c0_15] : memref<4x288xbf16, #tpu.memory_space<vmem>>, vector<4x288xbf16>
    %c9_i32_16 = arith.constant 9 : i32
    %77 = tpu.dynamic_rotate %75 by %c9_i32_16 dim 1 : vector<32x256xf32>, i32 -> vector<32x256xf32>
    %78 = vector.broadcast %18 : vector<1x256xf32> to vector<32x256xf32>
    %79 = arith.mulf %77, %78 : vector<32x256xf32>
    %c8_i32_17 = arith.constant 8 : i32
    %80 = tpu.dynamic_rotate %75 by %c8_i32_17 dim 1 : vector<32x256xf32>, i32 -> vector<32x256xf32>
    %81 = vector.broadcast %20 : vector<1x256xf32> to vector<32x256xf32>
    %82 = arith.mulf %80, %81 : vector<32x256xf32>
    %c7_i32_18 = arith.constant 7 : i32
    %83 = tpu.dynamic_rotate %75 by %c7_i32_18 dim 1 : vector<32x256xf32>, i32 -> vector<32x256xf32>
    %84 = vector.broadcast %23 : vector<1x256xf32> to vector<32x256xf32>
    %85 = arith.mulf %83, %84 : vector<32x256xf32>
    %c1_i32_19 = arith.constant 1 : i32
    %86 = tpu.dynamic_rotate %75 by %c1_i32_19 dim 1 : vector<32x256xf32>, i32 -> vector<32x256xf32>
    %87 = vector.broadcast %25 : vector<1x256xf32> to vector<32x256xf32>
    %88 = arith.mulf %86, %87 : vector<32x256xf32>
    %c255_i32_20 = arith.constant 255 : i32
    %89 = tpu.dynamic_rotate %75 by %c255_i32_20 dim 1 : vector<32x256xf32>, i32 -> vector<32x256xf32>
    %90 = vector.broadcast %27 : vector<1x256xf32> to vector<32x256xf32>
    %91 = arith.mulf %89, %90 : vector<32x256xf32>
    %c249_i32_21 = arith.constant 249 : i32
    %92 = tpu.dynamic_rotate %75 by %c249_i32_21 dim 1 : vector<32x256xf32>, i32 -> vector<32x256xf32>
    %93 = vector.broadcast %30 : vector<1x256xf32> to vector<32x256xf32>
    %94 = arith.mulf %92, %93 : vector<32x256xf32>
    %c248_i32_22 = arith.constant 248 : i32
    %95 = tpu.dynamic_rotate %75 by %c248_i32_22 dim 1 : vector<32x256xf32>, i32 -> vector<32x256xf32>
    %96 = vector.broadcast %32 : vector<1x256xf32> to vector<32x256xf32>
    %97 = arith.mulf %95, %96 : vector<32x256xf32>
    %c247_i32_23 = arith.constant 247 : i32
    %98 = tpu.dynamic_rotate %75 by %c247_i32_23 dim 1 : vector<32x256xf32>, i32 -> vector<32x256xf32>
    %99 = vector.broadcast %35 : vector<1x256xf32> to vector<32x256xf32>
    %100 = arith.mulf %98, %99 : vector<32x256xf32>
    %101 = tpu.concatenate %79, %82, %85, %88, %75, %91, %94, %97, %100 in 0 : vector<32x256xf32>, vector<32x256xf32>, vector<32x256xf32>, vector<32x256xf32>, vector<32x256xf32>, vector<32x256xf32>, vector<32x256xf32>, vector<32x256xf32>, vector<32x256xf32> -> vector<288x256xf32>
    %102 = arith.truncf %101 : vector<288x256xf32> to vector<288x256xbf16>
    %cst_24 = arith.constant dense<0.000000e+00> : vector<4x256xf32>
    %103 = tpu.matmul %76, %102, %cst_24 {dimension_numbers = #tpu.dot_dimension_numbers<[1], [0], [0], [1], [0, 0, 1, 1], [], []>} : vector<4x288xbf16>, vector<288x256xbf16>, vector<4x256xf32> -> vector<4x256xf32>
    %c0_25 = arith.constant 0 : index
    %c0_26 = arith.constant 0 : index
    %104 = vector.load %arg5[%c0_25, %c0_26] : memref<4x1xf32, #tpu.memory_space<vmem>>, vector<4x1xf32>
    %105 = vector.broadcast %104 : vector<4x1xf32> to vector<4x256xf32>
    %106 = arith.addf %103, %105 : vector<4x256xf32>
    %c0_27 = arith.constant 0 : index
    %c0_28 = arith.constant 0 : index
    %107 = vector.load %arg6[%c0_27, %c0_28] : memref<4x256xf32, #tpu.memory_space<vmem>>, vector<4x256xf32>
    tpu.vector_store %arg6[%c0_27, %c0_28], %106 {strides = array<i32>} : memref<4x256xf32, #tpu.memory_space<vmem>>, vector<4x256xf32>,
    return
  }
}

</mosaic_0001>

<bundles_post_ra>
// kernel: decoder_pathway_forward.1
= control target key start
LH: loop header
LB: loop body
LE: loop exit
PB: predicated region body
PF: predicated region fallthrough
CT: control target
= control target key end

     0   :  { %v25_v0 = vlaneseq  ;;  %vm109_vm0 = vcmask 130048   ;;  %v1803_v1 = vmov 0.0   ;;  %v1804_v31 = vmov 1.0|1.0   ;;  %s1807_s7 = smov 7   ;;  %s1808_s8 = smov 1   ;;  %s3141_s0 = inlined_call_operand.vmem [shape: s32[1,256], index: 0, kind: input, shape index: {}]   ;;  %s3142_s1 = inlined_call_operand.vmem [shape: f32[32,16], index: 1, kind: input, shape index: {}]   ;;  %s3143_s2 = inlined_call_operand.vmem [shape: bf16[32,288], index: 2, kind: input, shape index: {}]   ;;  %s3144_s3 = inlined_call_operand.vmem [shape: f32[32,1], index: 3, kind: input, shape index: {}]   ;;  %s3145_s4 = inlined_call_operand.vmem [shape: bf16[4,288], index: 4, kind: input, shape index: {}]   ;;  %s3146_s5 = inlined_call_operand.vmem [shape: f32[4,1], index: 5, kind: input, shape index: {}]   ;;  %s3147_s6 = inlined_call_operand.vmem [shape: f32[4,256], index: 6, kind: output, shape index: {}]  }
   0x1   :  { %190 = vmatprep.mubr.f32.mxu0 %v1803_v1  ;;  %v105_v2 = vld [vmem:[%s3142_s1] sm:$0xff]  ;;  %v106_v3 = vld [vmem:[%s3142_s1 + $0x8] sm:$0xff]  ;;  %v107_v7 = vld [vmem:[%s3142_s1 + $0x10] sm:$0xff]  ;;  %s1809_s9 = smov 127   ;;  %s1810_s10 = smov 121  }
   0x2   :  { %v1858_v4 = vshrl.u32 %v25_v0, 7  ;;  %v111_v5 = vsel %vm109_vm0, %v105_v2, 0  ;;  %v114_v6 = vsel %vm109_vm0, %v106_v3, 0  ;;  %v108_v8 = vld [vmem:[%s3142_s1 + $0x18] sm:$0xff]  ;;  %v24_v9 = vld [vmem:[%s3141_s0] sm:$0x3] }
   0x3   :  { %v1869_v10 = vand.u32 4294901760, %v111_v5  ;;  %v1871_v11 = vand.u32 4294901760, %v114_v6  ;;  %v117_v12 = vsel %vm109_vm0, %v107_v7, 0  ;;  %v120_v13 = vsel %vm109_vm0, %v108_v8, 0  ;;  %s1805_s0 = smov 9   ;;  %s1806_s1 = smov 8  }
   0x4   :  { %v84_v14 = vadd.s32 8, %v1858_v4  ;;  %v91_v15 = vsub.s32 1, %v1858_v4  ;;  %v87_v16 = vsub.s32 0, %v1858_v4  ;;  %v1876_v17 = vand.u32 4294901760, %v117_v12  ;;  %s1811_s11 = smov 120   ;;  %s1812_s12 = smov 119  }
   0x5   :  { %v1879_v18 = vsub.f32 %v111_v5, %v1869_v10  ;;  %v1882_v19 = vsub.f32 %v114_v6, %v1871_v11  ;;  %v1889_v25 = vand.u32 4294901760, %v120_v13  ;;  %v1068_v28 = vld [vmem:[%s3144_s3] sm:$0xff] }
   0x6   :  { %v92_v20 = vrot.slane %v24_v9, %v91_v15  ;;  %v88_v21 = vrot.slane %v24_v9, %v87_v16  ;;  %v1887_v24 = vsub.f32 %v117_v12, %v1876_v17 }
   0x7   :  { %v193_v22 = vand.u32 4294901760, %v1879_v18  ;;  %v204_v23 = vand.u32 4294901760, %v1882_v19  ;;  %v1921_v40 = vsub.f32 %v120_v13, %v1889_v25 }
   0x8   :  { %vm94_vm1 = vcmp.eq.s32.totalorder %v1858_v4, %v92_v20  ;;  %vm96_vm2 = vcmp.eq.s32.totalorder %v84_v14, %v92_v20  ;;  %vm93_vm3 = vcmp.eq.s32.totalorder %v1858_v4, %v88_v21  ;;  %vm95_vm4 = vcmp.eq.s32.totalorder %v84_v14, %v88_v21 }
   0x9   :  { %v1672_v26 = vsel %vm94_vm1, 1.0, %v1803_v1  ;;  %v1674_v27 = vsel %vm96_vm2, 1.0, %v1803_v1  ;;  %vm1895_vm5 = vmpackc.low %vm96_vm2, %vm94_vm1  ;;  %v1671_v29 = vsel %vm93_vm3, 1.0, %v1803_v1  ;;  %v1673_v30 = vsel %vm95_vm4, 1.0, %v1803_v1 }
   0xa   :  { %1697 = vmatprep.subr.msk.bf16.mxu0 %vm1895_vm5, %v1804_v31  ;;  %v236_v32 = vsub.f32 %v1672_v26, %v1672_v26  ;;  %v248_v33 = vsub.f32 %v1674_v27, %v1674_v27  ;;  %vm1904_vm6 = vmpackc.low %vm95_vm4, %vm93_vm3  ;;  %v1908_v35 = vsub.f32 %v1671_v29, %v1671_v29  ;;  %v254_v36 = vsub.f32 %v1673_v30, %v1673_v30  ;;  %v1069_v29 = vld [vmem:[%s3144_s3 + $0x8] sm:$0xff] }
   0xb   :  { %1699 = vmatpush1.bf16.msk.msra.mxu0 %vm1904_vm6, %v1804_v31  ;;  %v194_v37 = vsub.f32 %v1879_v18, %v193_v22  ;;  %v205_v38 = vsub.f32 %v1882_v19, %v204_v23  ;;  %v215_v39 = vand.u32 4294901760, %v1887_v24  ;;  %v226_v52 = vand.u32 4294901760, %v1921_v40 }
   0xc   :  { %v243_v41 = vand.u32 4294901760, %v1908_v35  ;;  %v255_v42 = vand.u32 4294901760, %v254_v36  ;;  %v237_v43 = vand.u32 4294901760, %v236_v32  ;;  %v249_v44 = vand.u32 4294901760, %v248_v33 }
   0xd   :  { %v195_v45 = vand.u32 4294901760, %v194_v37  ;;  %v206_v50 = vand.u32 4294901760, %v205_v38  ;;  %v216_v51 = vsub.f32 %v1887_v24, %v215_v39  ;;  %v1704_v59 = vpack.c.bf16 %v248_v33, %v236_v32 }
   0xe   :  { %v244_v46 = vsub.f32 %v1908_v35, %v243_v41  ;;  %v256_v47 = vsub.f32 %v254_v36, %v255_v42  ;;  %v238_v48 = vsub.f32 %v236_v32, %v237_v43  ;;  %v250_v49 = vsub.f32 %v248_v33, %v249_v44  ;;  %v1071_v32 = vld [vmem:[%s3144_s3 + $0x18] sm:$0xff]  ;;  %v1070_v33 = vld [vmem:[%s3144_s3 + $0x10] sm:$0xff] }
   0xf   :  { %196 = vmatmul.mubr.f32.vlgmr.msra.gmra.mrb[0].mxu0 %v195_v45  ;;  %v217_v60 = vand.u32 4294901760, %v216_v51  ;;  %v227_v61 = vsub.f32 %v1921_v40, %v226_v52  ;;  %v1706_v63 = vpack.c.bf16 %v254_v36, %v1908_v35  ;;  %v1712_v2 = vpack.c.bf16 %v249_v44, %v237_v43 }
  0x10   :  { %v245_v53 = vand.u32 4294901760, %v244_v46  ;;  %v257_v54 = vand.u32 4294901760, %v256_v47  ;;  %201 = vmatprep.mubr.f32.mxu0 %v1803_v1  ;;  %v239_v55 = vand.u32 4294901760, %v238_v48  ;;  %v251_v56 = vand.u32 4294901760, %v250_v49 }
  0x11   :  { %v228_v62 = vand.u32 4294901760, %v227_v61  ;;  %v1714_v3 = vpack.c.bf16 %v255_v42, %v243_v41  ;;  %v2167_v30 = vand.u32 127, %v25_v0 }
  0x12   :  { %v1700_v57 = vpack.c.bf16 %v251_v56, %v239_v55  ;;  %v1702_v58 = vpack.c.bf16 %v257_v54, %v245_v53 }
  0x13   :  { %207 = vmatmul.mubr.f32.gmra.mrb[2].mxu0 %v206_v50  ;;  %v27_v36 = vadd.s32 128, %v2167_v30  ;;  %v30_v0 = vshra.s32 %v2167_v30, 3  ;;  %v28_v41 = vand.u32 7, %v2167_v30  ;;  %vm784_vm12 = vcmp.lt.s32.totalorder %v2167_v30, 9 }
  0x14   :  { %1701 = vmatprep.subr.bf16.mxu0 %v1700_v57  ;;  %212 = vmatprep.mubr.f32.mxu0 %v1803_v1  ;;  %vm817_vm14 = vcmp.lt.s32.totalorder %v2167_v30, 8  ;;  %vm850_vm0 = vcmp.lt.s32.totalorder %v2167_v30, 7  ;;  %vm883_vm4 = vcmp.lt.s32.totalorder %v2167_v30, 1 }
  0x15   :  { %1703 = vmatpush1.bf16.msra.mxu0 %v1702_v58  ;;  %v31_v38 = vshra.s32 %v27_v36, 3  ;;  %v29_v44 = vand.u32 7, %v27_v36  ;;  %vm2195_vm8 = vcmp.ge.s32.totalorder %v28_v41, 1  ;;  %vm2308_vm2 = vcmp.le.s32.totalorder %v28_v41, 6 }
  0x16   :  { %1705 = vmatprep.subr.bf16.mxu0 %v1704_v59 }
  0x17   :  { %218 = vmatmul.mubr.f32.gmra.mrb[4].mxu0 %v217_v60  ;;  %v2190_v43 = vand.u32 7, %v31_v38  ;;  %vm2202_vm10 = vcmp.ge.s32.totalorder %v29_v44, 1  ;;  %vm2259_vm15 = vcmp.le.s32.totalorder %v29_v44, 6 }
  0x18   :  { %223 = vmatprep.mubr.f32.mxu0 %v1803_v1 }
  0x19   :  { %vm35_vm9 = vcmp.ge.s32.totalorder %v2190_v43, 1 }
  0x1a   :  { %vm43_vm13 = vmand %vm35_vm9, %vm2202_vm10 }
  0x1b   :  { %229 = vmatmul.mubr.f32.gmra.mrb[6].mxu0 %v228_v62  ;;  %v2224_v53 = vsel %vm43_vm13, 1.0, %v1803_v1  ;;  %vm53_vm1 = vmand %vm35_vm9, %vm2259_vm15 }
  0x1c   :  { %319 = vmatprep.mubr.f32.mxu0 %v1803_v1 }
  0x1f   :  { %321 = vmatmul.mubr.f32.vlgmr.msra.gmra.mrb[0].mxu0 %v1869_v10 }
  0x20   :  { %326 = vmatprep.mubr.f32.mxu0 %v1803_v1  ;;  %1707 = vmatpush1.bf16.msra.mxu0 %v1706_v63 }
  0x21   :  { %1709 = vmatprep.subr.msk.bf16.mxu0 %vm1895_vm5, %v1804_v31 }
  0x23   :  { %328 = vmatmul.mubr.f32.gmra.mrb[2].mxu0 %v1871_v11 }
  0x24   :  { %333 = vmatprep.mubr.f32.mxu0 %v1803_v1 }
  0x27   :  { %335 = vmatmul.mubr.f32.gmra.mrb[4].mxu0 %v1876_v17 }
  0x28   :  { %340 = vmatprep.mubr.f32.mxu0 %v1803_v1 }
  0x2b   :  { %342 = vmatmul.mubr.f32.gmra.mrb[6].mxu0 %v1889_v25 }
  0x2c   :  { %420 = vmatprep.mubr.f32.mxu0 %v1803_v1 }
  0x2f   :  { %423 = vmatmul.mubr.f32.vlgmr.msra.gmra.mrb[0].mxu0 %v1879_v18  ;;  %v1796_v18 = vld [vmem:[%s3143_s2 + $0x4] ss:$12 sps:$4 sm:$0xff]  }
  0x30   :  { %428 = vmatprep.mubr.f32.mxu0 %v1803_v1  ;;  %1711 = vmatpush1.bf16.msk.msra.mxu0 %vm1904_vm6, %v1804_v31 }
  0x31   :  { %1713 = vmatprep.subr.bf16.mxu0 %v1712_v2  ;;  %1161 = vmatprep.mubr.bf16.mxu1 %v1796_v18 }
  0x33   :  { %431 = vmatmul.mubr.f32.gmra.mrb[2].mxu0 %v1882_v19 }
  0x34   :  { %436 = vmatprep.mubr.f32.mxu0 %v1803_v1 }
  0x37   :  { %439 = vmatmul.mubr.f32.gmra.mrb[4].mxu0 %v1887_v24 }
  0x38   :  { %444 = vmatprep.mubr.f32.mxu0 %v1803_v1 }
  0x3b   :  { %447 = vmatmul.mubr.f32.gmra.mrb[6].mxu0 %v1921_v40  ;;  %v2185_v40 = vand.u32 7, %v30_v0 }
  0x3c   :  { %521 = vmatprep.mubr.f32.mxu0 %v1803_v1 }
  0x3d   :  { %vm34_vm7 = vcmp.ge.s32.totalorder %v2185_v40, 1 }
  0x3e   :  { %vm42_vm11 = vmand %vm34_vm7, %vm2195_vm8 }
  0x3f   :  { %525 = vmatmul.mubr.f32.vlgmr.msra.gmra.mrb[0].mxu0 %v193_v22  ;;  %v3148_v22 = vmov 0   ;;  %v2229_v55 = vsel %vm42_vm11, 1.0, %v1803_v1  ;;  %vm52_vm3 = vmand %vm34_vm7, %vm2308_vm2  ;;  %vm949_vm11 = vcmp.lt.s32.totalorder %v2167_v30, 121 }
  0x40   :  { %530 = vmatprep.mubr.f32.mxu0 %v1803_v1  ;;  %1715 = vmatpush1.bf16.msra.mxu0 %v1714_v3 }
  0x41   :  { %1717 = vmatprep.subr.msk.bf16.mxu0 %vm1895_vm5, %v1804_v31  ;;  %1793 = vset.pattern.permute.xlu1 %v3148_v22  ;;  %vm916_vm5 = vcmp.lt.s32.totalorder %v2167_v30, 127 }
  0x42   :  { %1792 = vset.pattern.permute.xlu0 %v3148_v22 }
  0x43   :  { %534 = vmatmul.mubr.f32.gmra.mrb[2].mxu0 %v204_v23 }
  0x44   :  { %539 = vmatprep.mubr.f32.mxu0 %v1803_v1 }
  0x47   :  { %543 = vmatmul.mubr.f32.gmra.mrb[4].mxu0 %v215_v39 }
  0x48   :  { %548 = vmatprep.mubr.f32.mxu0 %v1803_v1 }
  0x4b   :  { %552 = vmatmul.mubr.f32.gmra.mrb[6].mxu0 %v226_v52 }
  0x4c   :  { %634 = vmatprep.mubr.f32.mxu0 %v1803_v1 }
  0x4f   :  { %636 = vmatmul.mubr.f32.vlgmr.msra.gmra.mrb[0].mxu0 %v1869_v10 }
  0x50   :  { %641 = vmatprep.mubr.f32.mxu0 %v1803_v1  ;;  %1719 = vmatpush1.bf16.msk.msra.mxu0 %vm1904_vm6, %v1804_v31  ;;  %vm36_vm6 = vcmp.le.s32.totalorder %v2185_v40, 6 }
  0x51   :  { %vm76_vm13 = vmand %vm36_vm6, %vm2308_vm2 }
  0x53   :  { %643 = vmatmul.mubr.f32.gmra.mrb[2].mxu0 %v1871_v11 }
  0x54   :  { %648 = vmatprep.mubr.f32.mxu0 %v1803_v1 }
  0x57   :  { %650 = vmatmul.mubr.f32.gmra.mrb[4].mxu0 %v1876_v17 }
  0x58   :  { %655 = vmatprep.mubr.f32.mxu0 %v1803_v1 }
  0x5b   :  { %657 = vmatmul.mubr.f32.gmra.mrb[6].mxu0 %v1889_v25 }
  0x5c   :  { %731 = vmatprep.mubr.f32.mxu0 %v1803_v1 }
  0x5f   :  { %733 = vmatmul.mubr.f32.vlgmr.msra.gmra.mrb[0].mxu0 %v1869_v10 }
  0x60   :  { %738 = vmatprep.mubr.f32.mxu0 %v1803_v1 }
  0x63   :  { %740 = vmatmul.mubr.f32.gmra.mrb[2].mxu0 %v1871_v11 }
  0x64   :  { %745 = vmatprep.mubr.f32.mxu0 %v1803_v1 }
  0x67   :  { %747 = vmatmul.mubr.f32.gmra.mrb[4].mxu0 %v1876_v17 }
  0x68   :  { %752 = vmatprep.mubr.f32.mxu0 %v1803_v1 }
  0x6b   :  { %754 = vmatmul.mubr.f32.gmra.mrb[6].mxu0 %v1889_v25 }
  0x6c   :  { %1214 = vmatprep.mubr.bf16.mxu0 %v3148_v22 }
 0x132   :  { %v1988_v5 = vpop.f32.mrb[0].mxu0 }
 0x133   :  { %768 = vrot.lane.b32.xlu0 %v1988_v5, %s1805_s0  ;;  %v1992_v6 = vpop.f32.mrb[1].mxu0 }
 0x134   :  { %776 = vrot.lane.b32.xlu1 %v1992_v6, %s1805_s0 }
 0x136   :  { %v1996_v7 = vpop.f32.mrb[2].mxu0 }
 0x137   :  { %801 = vrot.lane.b32.xlu0 %v1988_v5, %s1806_s1  ;;  %v2000_v8 = vpop.f32.mrb[3].mxu0  ;;  %v1048_v9 = vpack.c.bf16 %v1996_v7, %v1988_v5 }
 0x138   :  { %803 = vrot.lane.b32.xlu1 %v1996_v7, %s1806_s1  ;;  %v1049_v10 = vpack.c.bf16 %v2000_v8, %v1992_v6 }
 0x13a   :  { %v2008_v11 = vpop.f32.mrb[4].mxu0 }
 0x13b   :  { %834 = vrot.lane.b32.xlu0 %v1988_v5, %s1807_s7  ;;  %v2012_v12 = vpop.f32.mrb[5].mxu0 }
 0x13c   :  { %836 = vrot.lane.b32.xlu1 %v1996_v7, %s1807_s7 }
 0x13e   :  { %v2016_v13 = vpop.f32.mrb[6].mxu0 }
 0x13f   :  { %867 = vrot.lane.b32.xlu0 %v1988_v5, %s1808_s8  ;;  %v2020_v14 = vpop.f32.mrb[7].mxu0 }
 0x140   :  { %869 = vrot.lane.b32.xlu1 %v1996_v7, %s1808_s8 }
 0x143   :  { %900 = vrot.lane.b32.xlu0 %v1988_v5, %s1809_s9 }
 0x144   :  { %902 = vrot.lane.b32.xlu1 %v1996_v7, %s1809_s9 }
 0x147   :  { %933 = vrot.lane.b32.xlu0 %v1988_v5, %s1810_s10 }
 0x148   :  { %935 = vrot.lane.b32.xlu1 %v1996_v7, %s1810_s10 }
 0x14b   :  { %809 = vrot.lane.b32.xlu0 %v1992_v6, %s1806_s1 }
 0x14c   :  { %778 = vrot.lane.b32.xlu1 %v2000_v8, %s1805_s0 }
 0x14f   :  { %842 = vrot.lane.b32.xlu0 %v1992_v6, %s1807_s7 }
 0x150   :  { %811 = vrot.lane.b32.xlu1 %v2000_v8, %s1806_s1 }
 0x153   :  { %875 = vrot.lane.b32.xlu0 %v1992_v6, %s1808_s8 }
 0x154   :  { %844 = vrot.lane.b32.xlu1 %v2000_v8, %s1807_s7 }
 0x157   :  { %908 = vrot.lane.b32.xlu0 %v1992_v6, %s1809_s9 }
 0x158   :  { %877 = vrot.lane.b32.xlu1 %v2000_v8, %s1808_s8 }
 0x15b   :  { %770 = vrot.lane.b32.xlu0 %v1996_v7, %s1805_s0 }
 0x15c   :  { %910 = vrot.lane.b32.xlu1 %v2000_v8, %s1809_s9 }
 0x15f   :  { %772 = vrot.lane.b32.xlu0 %v2008_v11, %s1805_s0 }
 0x160   :  { %774 = vrot.lane.b32.xlu1 %v2016_v13, %s1805_s0 }
 0x163   :  { %805 = vrot.lane.b32.xlu0 %v2008_v11, %s1806_s1 }
 0x164   :  { %807 = vrot.lane.b32.xlu1 %v2016_v13, %s1806_s1 }
 0x167   :  { %838 = vrot.lane.b32.xlu0 %v2008_v11, %s1807_s7 }
 0x168   :  { %840 = vrot.lane.b32.xlu1 %v2016_v13, %s1807_s7 }
 0x16b   :  { %871 = vrot.lane.b32.xlu0 %v2008_v11, %s1808_s8 }
 0x16c   :  { %873 = vrot.lane.b32.xlu1 %v2016_v13, %s1808_s8 }
 0x16f   :  { %904 = vrot.lane.b32.xlu0 %v2008_v11, %s1809_s9 }
 0x170   :  { %906 = vrot.lane.b32.xlu1 %v2016_v13, %s1809_s9 }
 0x173   :  { %780 = vrot.lane.b32.xlu0 %v2012_v12, %s1805_s0 }
 0x174   :  { %782 = vrot.lane.b32.xlu1 %v2020_v14, %s1805_s0 }
 0x177   :  { %941 = vrot.lane.b32.xlu0 %v1992_v6, %s1810_s10 }
 0x178   :  { %943 = vrot.lane.b32.xlu1 %v2000_v8, %s1810_s10 }
 0x17b   :  { %813 = vrot.lane.b32.xlu0 %v2012_v12, %s1806_s1 }
 0x17c   :  { %815 = vrot.lane.b32.xlu1 %v2020_v14, %s1806_s1 }
 0x17f   :  { %846 = vrot.lane.b32.xlu0 %v2012_v12, %s1807_s7 }
 0x180   :  { %939 = vrot.lane.b32.xlu1 %v2016_v13, %s1810_s10 }
 0x183   :  { %879 = vrot.lane.b32.xlu0 %v2012_v12, %s1808_s8 }
 0x184   :  { %848 = vrot.lane.b32.xlu1 %v2020_v14, %s1807_s7 }
 0x187   :  { %912 = vrot.lane.b32.xlu0 %v2012_v12, %s1809_s9 }
 0x188   :  { %968 = vrot.lane.b32.xlu1 %v1996_v7, %s1811_s11 }
 0x18b   :  { %937 = vrot.lane.b32.xlu0 %v2008_v11, %s1810_s10 }
 0x18c   :  { %881 = vrot.lane.b32.xlu1 %v2020_v14, %s1808_s8 }
 0x18f   :  { %945 = vrot.lane.b32.xlu0 %v2012_v12, %s1810_s10 }
 0x190   :  { %976 = vrot.lane.b32.xlu1 %v2000_v8, %s1811_s11 }
 0x193   :  { %966 = vrot.lane.b32.xlu0 %v1988_v5, %s1811_s11 }
 0x194   :  { %1001 = vrot.lane.b32.xlu1 %v1996_v7, %s1812_s12 }
 0x197   :  { %974 = vrot.lane.b32.xlu0 %v1992_v6, %s1811_s11 }
 0x198   :  { %1009 = vrot.lane.b32.xlu1 %v2000_v8, %s1812_s12 }
 0x19b   :  { %999 = vrot.lane.b32.xlu0 %v1988_v5, %s1812_s12 }
 0x19c   :  { %914 = vrot.lane.b32.xlu1 %v2020_v14, %s1809_s9 }
 0x19f   :  { %1007 = vrot.lane.b32.xlu0 %v1992_v6, %s1812_s12  ;;  %v2464_v6 = vsel %vm2308_vm2, 1.0, %v1803_v1  ;;  %vm1122_vm2 = vcmask 261120  }
 0x1a0   :  { %972 = vrot.lane.b32.xlu1 %v2016_v13, %s1811_s11 }
 0x1a3   :  { %970 = vrot.lane.b32.xlu0 %v2008_v11, %s1811_s11 }
 0x1a4   :  { %947 = vrot.lane.b32.xlu1 %v2020_v14, %s1810_s10 }
 0x1a5   :  { %v769_v17 = vpop.permute.xlu0 %768 }
 0x1a6   :  { %v777_v19 = vpop.permute.xlu1 %776 }
 0x1a7   :  { %978 = vrot.lane.b32.xlu0 %v2012_v12, %s1811_s11  ;;  %v789_v52 = vsel %vm784_vm12, %v777_v19, %v769_v17  ;;  %v785_v54 = vsel %vm784_vm12, %v769_v17, %v777_v19 }
 0x1a8   :  { %1005 = vrot.lane.b32.xlu1 %v2016_v13, %s1812_s12  ;;  %v794_v60 = vmul.f32 %v2224_v53, %v785_v54  ;;  %v793_v62 = vmul.f32 %v2229_v55, %v789_v52 }
 0x1a9   :  { %v2135_v20 = vpop.permute.xlu0 %801 }
 0x1aa   :  { %v2137_v21 = vpop.permute.xlu1 %803 }
 0x1ab   :  { %1003 = vrot.lane.b32.xlu0 %v2008_v11, %s1812_s12 }
 0x1ac   :  { %980 = vrot.lane.b32.xlu1 %v2020_v14, %s1811_s11 }
 0x1ad   :  { %v2146_v23 = vpop.permute.xlu0 %834 }
 0x1ae   :  { %v2148_v24 = vpop.permute.xlu1 %836 }
 0x1af   :  { %1011 = vrot.lane.b32.xlu0 %v2012_v12, %s1812_s12 }
 0x1b0   :  { %1013 = vrot.lane.b32.xlu1 %v2020_v14, %s1812_s12 }
 0x1b1   :  { %v2154_v25 = vpop.permute.xlu0 %867 }
 0x1b2   :  { %v2156_v26 = vpop.permute.xlu1 %869 }
 0x1b3   :  { %1074 = vperm.xlu0 %1792, %v1068_v28  }
 0x1b4   :  { %1079 = vperm.xlu1 %1793, %v1069_v29  }
 0x1b5   :  { %v2158_v27 = vpop.permute.xlu0 %900 }
 0x1b6   :  { %v2169_v31 = vpop.permute.xlu1 %902 }
 0x1b7   :  { %1089 = vperm.xlu0 %1792, %v1071_v32  }
 0x1b8   :  { %1084 = vperm.xlu1 %1793, %v1070_v33  }
 0x1b9   :  { %v2177_v34 = vpop.permute.xlu0 %933 }
 0x1ba   :  { %v2179_v35 = vpop.permute.xlu1 %935 }
 0x1bd   :  { %v2183_v37 = vpop.permute.xlu0 %809 }
 0x1be   :  { %v779_v39 = vpop.permute.xlu1 %778 }
 0x1c1   :  { %v2188_v42 = vpop.permute.xlu0 %842 }
 0x1c2   :  { %v812_v45 = vpop.permute.xlu1 %811 }
 0x1c3   :  { %v819_v54 = vsel %vm817_vm14, %v2137_v21, %v812_v45 }
 0x1c5   :  { %v2199_v47 = vpop.permute.xlu0 %875 }
 0x1c6   :  { %v2206_v49 = vpop.permute.xlu1 %844 }
 0x1c7   :  { %v852_v41 = vsel %vm850_vm0, %v2148_v24, %v2206_v49 }
 0x1c9   :  { %v2213_v50 = vpop.permute.xlu0 %908 }
 0x1ca   :  { %v2219_v51 = vpop.permute.xlu1 %877  ;;  %v917_v8 = vsel %vm916_vm5, %v2158_v27, %v2213_v50 }
 0x1cb   :  { %v925_v5 = vmul.f32 %v2464_v6, %v917_v8 }
 0x1cd   :  { %v771_v56 = vpop.permute.xlu0 %770 }
 0x1ce   :  { %v790_v57 = vsel %vm784_vm12, %v779_v39, %v771_v56  ;;  %v2233_v58 = vpop.permute.xlu1 %910  ;;  %v786_v59 = vsel %vm784_vm12, %v771_v56, %v779_v39  ;;  %v2257_v39 = vsel %vm35_vm9, 1.0, %v1803_v1  ;;  %vm2457_vm9 = vmand %vm36_vm6, %vm2195_vm8 }
 0x1cf   :  { %v796_v61 = vmul.f32 %v2224_v53, %v786_v59  ;;  %v795_v63 = vmul.f32 %v2229_v55, %v790_v57  ;;  %v818_v57 = vsel %vm817_vm14, %v2135_v20, %v2183_v37  ;;  %v823_v59 = vsel %vm817_vm14, %v812_v45, %v2137_v21 }
 0x1d0   :  { %v829_v22 = vmul.f32 %v2257_v39, %v819_v54 }
 0x1d1   :  { %v773_v2 = vpop.permute.xlu0 %772  ;;  %v1033_v3 = vpack.c.bf16 %v796_v61, %v794_v60  ;;  %v1032_v17 = vpack.c.bf16 %v795_v63, %v793_v62 }
 0x1d2   :  { %v775_v18 = vpop.permute.xlu1 %774 }
 0x1d3   :  { %1129 = vmatprep.subr.bf16.mxu1 %v1033_v3 }
 0x1d4   :  { %1130 = vmatpush1.bf16.msra.mxu1 %v1032_v17 }
 0x1d5   :  { %v806_v19 = vpop.permute.xlu0 %805 }
 0x1d6   :  { %v808_v28 = vpop.permute.xlu1 %807 }
 0x1d9   :  { %v2241_v29 = vpop.permute.xlu0 %838 }
 0x1da   :  { %v2243_v32 = vpop.permute.xlu1 %840 }
 0x1dd   :  { %v2245_v33 = vpop.permute.xlu0 %871 }
 0x1de   :  { %v2247_v36 = vpop.permute.xlu1 %873 }
 0x1e1   :  { %v2249_v0 = vpop.permute.xlu0 %904 }
 0x1e2   :  { %v2251_v38 = vpop.permute.xlu1 %906 }
 0x1e5   :  { %v781_v56 = vpop.permute.xlu0 %780 }
 0x1e6   :  { %v787_v44 = vsel %vm784_vm12, %v773_v2, %v781_v56  ;;  %v791_v60 = vsel %vm784_vm12, %v781_v56, %v773_v2  ;;  %v783_v61 = vpop.permute.xlu1 %782  ;;  %v2289_v2 = vsel %vm34_vm7, 1.0, %v1803_v1  ;;  %v822_v56 = vsel %vm817_vm14, %v2183_v37, %v2135_v20 }
 0x1e7   :  { %v797_v62 = vmul.f32 %v2229_v55, %v791_v60  ;;  %v798_v63 = vmul.f32 %v2224_v53, %v787_v44  ;;  %v788_v3 = vsel %vm784_vm12, %v775_v18, %v783_v61  ;;  %v792_v17 = vsel %vm784_vm12, %v783_v61, %v775_v18 }
 0x1e8   :  { %v799_v21 = vmul.f32 %v2229_v55, %v792_v17  ;;  %v800_v45 = vmul.f32 %v2224_v53, %v788_v3  ;;  %v827_v18 = vmul.f32 %v2257_v39, %v818_v57  ;;  %v828_v54 = vmul.f32 %v2289_v2, %v823_v59 }
 0x1e9   :  { %v2296_v44 = vpop.permute.xlu0 %941  ;;  %v826_v37 = vmul.f32 %v2289_v2, %v822_v56  ;;  %v2314_v17 = vsel %vm53_vm1, 1.0, %v1803_v1  ;;  %v851_v59 = vsel %vm850_vm0, %v2146_v23, %v2188_v42  ;;  %vm37_vm7 = vcmp.le.s32.totalorder %v2190_v43, 6 }
 0x1ea   :  { %v2304_v60 = vpop.permute.xlu1 %943  ;;  %v1035_v61 = vpack.c.bf16 %v800_v45, %v798_v63  ;;  %v1034_v3 = vpack.c.bf16 %v799_v21, %v797_v62  ;;  %v1037_v57 = vpack.c.bf16 %v829_v22, %v827_v18  ;;  %v856_v22 = vsel %vm850_vm0, %v2206_v49, %v2148_v24 }
 0x1eb   :  { %v1036_v56 = vpack.c.bf16 %v828_v54, %v826_v37  ;;  %v862_v24 = vmul.f32 %v2314_v17, %v852_v41  ;;  %v855_v54 = vsel %vm850_vm0, %v2188_v42, %v2146_v23  ;;  %v955_v52 = vsel %vm949_vm11, %v2304_v60, %v2179_v35 }
 0x1ec   :  { %1131 = vmatprep.subr.bf16.mxu1 %v1035_v61  ;;  %vm982_vm1 = vcmp.lt.s32.totalorder %v2167_v30, 120 }
 0x1ed   :  { %v814_v62 = vpop.permute.xlu0 %813  ;;  %1132 = vmatpush1.bf16.msra.mxu1 %v1034_v3 }
 0x1ee   :  { %v820_v63 = vsel %vm817_vm14, %v806_v19, %v814_v62  ;;  %v824_v21 = vsel %vm817_vm14, %v814_v62, %v806_v19  ;;  %1133 = vmatprep.subr.bf16.mxu1 %v1037_v57  ;;  %v816_v45 = vpop.permute.xlu1 %815  ;;  %v2346_v19 = vsel %vm52_vm3, 1.0, %v1803_v1  ;;  %v860_v57 = vmul.f32 %v2314_v17, %v851_v59 }
 0x1ef   :  { %v830_v18 = vmul.f32 %v2289_v2, %v824_v21  ;;  %v831_v61 = vmul.f32 %v2257_v39, %v820_v63  ;;  %v821_v3 = vsel %vm817_vm14, %v808_v28, %v816_v45  ;;  %v825_v15 = vsel %vm817_vm14, %v816_v45, %v808_v28 }
 0x1f0   :  { %v832_v49 = vmul.f32 %v2289_v2, %v825_v15  ;;  %v833_v16 = vmul.f32 %v2257_v39, %v821_v3  ;;  %v861_v28 = vmul.f32 %v2346_v19, %v856_v22  ;;  %v859_v63 = vmul.f32 %v2346_v19, %v855_v54 }
 0x1f1   :  { %v847_v37 = vpop.permute.xlu0 %846  ;;  %1134 = vmatpush1.bf16.msra.mxu1 %v1036_v56  ;;  %v885_v21 = vsel %vm883_vm4, %v2156_v26, %v2219_v51  ;;  %v1041_v23 = vpack.c.bf16 %v862_v24, %v860_v57  ;;  %v2371_v22 = vsel %vm2202_vm10, 1.0, %v1803_v1  ;;  %v884_v45 = vsel %vm883_vm4, %v2154_v25, %v2199_v47 }
 0x1f2   :  { %v2354_v62 = vpop.permute.xlu1 %939  ;;  %v1039_v41 = vpack.c.bf16 %v833_v16, %v831_v61  ;;  %v1038_v15 = vpack.c.bf16 %v832_v49, %v830_v18  ;;  %v853_v42 = vsel %vm850_vm0, %v2241_v29, %v847_v37  ;;  %v857_v16 = vsel %vm850_vm0, %v847_v37, %v2241_v29 }
 0x1f3   :  { %v1040_v18 = vpack.c.bf16 %v861_v28, %v859_v63  ;;  %v889_v29 = vsel %vm883_vm4, %v2219_v51, %v2156_v26  ;;  %v895_v61 = vmul.f32 %v2371_v22, %v885_v21  ;;  %v863_v49 = vmul.f32 %v2346_v19, %v857_v16 }
 0x1f4   :  { %1135 = vmatprep.subr.bf16.mxu1 %v1039_v41  ;;  %v864_v54 = vmul.f32 %v2314_v17, %v853_v42  ;;  %v2395_v26 = vsel %vm2195_vm8, 1.0, %v1803_v1  ;;  %v893_v28 = vmul.f32 %v2371_v22, %v884_v45  ;;  %vm67_vm8 = vmand %vm37_vm7, %vm2202_vm10 }
 0x1f5   :  { %v880_v59 = vpop.permute.xlu0 %879  ;;  %1136 = vmatpush1.bf16.msra.mxu1 %v1038_v15  ;;  %v894_v21 = vmul.f32 %v2395_v26, %v889_v29  ;;  %vm77_vm10 = vmand %vm37_vm7, %vm2259_vm15  ;;  %v2496_v7 = vsel %vm67_vm8, 1.0, %v1803_v1 }
 0x1f6   :  { %1137 = vmatprep.subr.bf16.mxu1 %v1041_v23  ;;  %v849_v56 = vpop.permute.xlu1 %848  ;;  %v1045_v23 = vpack.c.bf16 %v895_v61, %v893_v28  ;;  %v886_v16 = vsel %vm883_vm4, %v2245_v33, %v880_v59 }
 0x1f7   :  { %v854_v3 = vsel %vm850_vm0, %v2243_v32, %v849_v56  ;;  %v858_v24 = vsel %vm850_vm0, %v849_v56, %v2243_v32  ;;  %v888_v32 = vsel %vm883_vm4, %v2199_v47, %v2154_v25  ;;  %v890_v25 = vsel %vm883_vm4, %v880_v59, %v2245_v33 }
 0x1f8   :  { %v865_v37 = vmul.f32 %v2346_v19, %v858_v24  ;;  %v866_v57 = vmul.f32 %v2314_v17, %v854_v3  ;;  %v892_v42 = vmul.f32 %v2395_v26, %v888_v32  ;;  %v896_v61 = vmul.f32 %v2395_v26, %v890_v25 }
 0x1f9   :  { %v913_v51 = vpop.permute.xlu0 %912  ;;  %1138 = vmatpush1.bf16.msra.mxu1 %v1040_v18  ;;  %v897_v3 = vmul.f32 %v2371_v22, %v886_v16  ;;  %v918_v32 = vsel %vm916_vm5, %v2169_v31, %v2233_v58  ;;  %v3168_v25 = vpack.c.bf16 %v2016_v13, %v2008_v11 }
 0x1fa   :  { %v2402_v41 = vpop.permute.xlu1 %968  ;;  %v1043_v15 = vpack.c.bf16 %v866_v57, %v864_v54  ;;  %v1042_v63 = vpack.c.bf16 %v865_v37, %v863_v49  ;;  %v1044_v29 = vpack.c.bf16 %v894_v21, %v892_v42  ;;  %v927_v46 = vmul.f32 %v2464_v6, %v918_v32 }
 0x1fb   :  { %v923_v20 = vsel %vm916_vm5, %v913_v51, %v2249_v0  ;;  %v2521_v42 = vsel %vm77_vm10, 1.0, %v1803_v1 }
 0x1fc   :  { %1139 = vmatprep.subr.bf16.mxu1 %v1043_v15  ;;  %v2447_v15 = vsel %vm2259_vm15, 1.0, %v1803_v1  ;;  %vm1015_vm15 = vcmp.lt.s32.totalorder %v2167_v30, 119 }
 0x1fd   :  { %v2412_v47 = vpop.permute.xlu0 %937  ;;  %1140 = vmatpush1.bf16.msra.mxu1 %v1042_v63  ;;  %v921_v63 = vsel %vm916_vm5, %v2213_v50, %v2158_v27  ;;  %v3167_v50 = vpack.c.bf16 %v2020_v14, %v2012_v12  ;;  %v2509_v12 = vsel %vm2457_vm9, 1.0, %v1803_v1  ;;  %v919_v14 = vsel %vm916_vm5, %v2249_v0, %v913_v51 }
 0x1fe   :  { %1141 = vmatprep.subr.bf16.mxu1 %v1045_v23  ;;  %v882_v45 = vpop.permute.xlu1 %881  ;;  %v926_v27 = vmul.f32 %v2447_v15, %v921_v63  ;;  %v2518_v23 = vsel %vm76_vm13, 1.0, %v1803_v1  ;;  %v950_v0 = vsel %vm949_vm11, %v2177_v34, %v2296_v44  ;;  %v929_v11 = vmul.f32 %v2464_v6, %v919_v14 }
 0x1ff   :  { %v887_v56 = vsel %vm883_vm4, %v2247_v36, %v882_v45  ;;  %v891_v18 = vsel %vm883_vm4, %v882_v45, %v2247_v36  ;;  %v922_v36 = vsel %vm916_vm5, %v2233_v58, %v2169_v31  ;;  %v1052_v45 = vpack.c.bf16 %v927_v46, %v925_v5 }
 0x200   :  { %v898_v33 = vmul.f32 %v2395_v26, %v891_v18  ;;  %v899_v59 = vmul.f32 %v2371_v22, %v887_v56  ;;  %v951_v56 = vsel %vm949_vm11, %v2179_v35, %v2304_v60  ;;  %v961_v18 = vmul.f32 %v2496_v7, %v955_v52 }
 0x201   :  { %v2424_v24 = vpop.permute.xlu0 %945  ;;  %1142 = vmatpush1.bf16.msra.mxu1 %v1044_v29  ;;  %v930_v13 = vmul.f32 %v2447_v15, %v923_v20  ;;  %v2578_v20 = vsel %vm37_vm7, 1.0, %v1803_v1 }
 0x202   :  { %v2426_v49 = vpop.permute.xlu1 %976  ;;  %v1047_v54 = vpack.c.bf16 %v899_v59, %v897_v3  ;;  %v1046_v37 = vpack.c.bf16 %v898_v33, %v896_v61  ;;  %v958_v33 = vmul.f32 %v2509_v12, %v950_v0  ;;  %v960_v59 = vmul.f32 %v2509_v12, %v951_v56 }
 0x204   :  { %1143 = vmatprep.subr.bf16.mxu1 %v1047_v54  ;;  %v952_v54 = vsel %vm949_vm11, %v2412_v47, %v2424_v24 }
 0x205   :  { %v2435_v57 = vpop.permute.xlu0 %966  ;;  %1144 = vmatpush1.bf16.msra.mxu1 %v1046_v37  ;;  %v962_v14 = vmul.f32 %v2509_v12, %v952_v54 }
 0x206   :  { %1145 = vmatprep.subr.bf16.mxu1 %v1049_v10  ;;  %v1002_v28 = vpop.permute.xlu1 %1001  ;;  %v928_v10 = vmul.f32 %v2447_v15, %v922_v36 }
 0x208   :  { %v1053_v21 = vpack.c.bf16 %v928_v10, %v926_v27  ;;  %v956_v27 = vsel %vm949_vm11, %v2424_v24, %v2412_v47  ;;  %v1056_v24 = vpack.c.bf16 %v960_v59, %v958_v33 }
 0x209   :  { %v2477_v58 = vpop.permute.xlu0 %974  ;;  %1146 = vmatpush1.bf16.msra.mxu1 %v1048_v9  ;;  %v954_v9 = vsel %vm949_vm11, %v2296_v44, %v2177_v34 }
 0x20a   :  { %v1010_v48 = vpop.permute.xlu1 %1009  ;;  %1147 = vmatprep.subr.bf16.mxu1 %v3167_v50  ;;  %v959_v51 = vmul.f32 %v2496_v7, %v954_v9  ;;  %v987_v50 = vsel %vm982_vm1, %v2477_v58, %v2435_v57 }
 0x20b   :  { %v1017_v44 = vsel %vm1015_vm15, %v1002_v28, %v1010_v48  ;;  %v1021_v35 = vsel %vm1015_vm15, %v1010_v48, %v1002_v28  ;;  %v992_v0 = vmul.f32 %v2578_v20, %v987_v50 }
 0x20c   :  { %v1026_v31 = vmul.f32 %v2518_v23, %v1017_v44  ;;  %v1027_v8 = vmul.f32 %v2521_v42, %v1021_v35  ;;  %v1057_v48 = vpack.c.bf16 %v961_v18, %v959_v51  ;;  %v2601_v18 = vsel %vm36_vm6, 1.0, %v1803_v1 }
 0x20d   :  { %v1000_v16 = vpop.permute.xlu0 %999  ;;  %1148 = vmatpush1.bf16.msra.mxu1 %v3168_v25  ;;  %3169 = vst [vmem:[#allocation2_spill] sm:$0xff] %v2601_v18 }
 0x20e   :  { %v915_v29 = vpop.permute.xlu1 %914  ;;  %1149 = vmatprep.subr.bf16.mxu1 %v1053_v21  ;;  %v963_v21 = vmul.f32 %v2496_v7, %v956_v27 }
 0x20f   :  { %v920_v61 = vsel %vm916_vm5, %v2251_v38, %v915_v29  ;;  %v924_v34 = vsel %vm916_vm5, %v915_v29, %v2251_v38 }
 0x210   :  { %v931_v60 = vmul.f32 %v2464_v6, %v920_v61  ;;  %v932_v3 = vmul.f32 %v2447_v15, %v924_v34 }
 0x211   :  { %v1008_v38 = vpop.permute.xlu0 %1007  ;;  %1150 = vmatpush1.bf16.msra.mxu1 %v1052_v45  ;;  %v983_v45 = vsel %vm982_vm1, %v2435_v57, %v2477_v58 }
 0x212   :  { %v1016_v37 = vsel %vm1015_vm15, %v1000_v16, %v1008_v38  ;;  %v1020_v36 = vsel %vm1015_vm15, %v1008_v38, %v1000_v16  ;;  %v973_v32 = vpop.permute.xlu1 %972  ;;  %v1055_v28 = vpack.c.bf16 %v932_v3, %v930_v13  ;;  %v1054_v63 = vpack.c.bf16 %v931_v60, %v929_v11 }
 0x213   :  { %v1024_v10 = vmul.f32 %v2518_v23, %v1016_v37  ;;  %v1025_v46 = vmul.f32 %v2521_v42, %v1020_v36  ;;  %v988_v16 = vsel %vm982_vm1, %v2426_v49, %v2402_v41  ;;  %v991_v61 = vmul.f32 %v2601_v18, %v983_v45 }
 0x214   :  { %1151 = vmatprep.subr.bf16.mxu1 %v1055_v28  ;;  %v994_v57 = vmul.f32 %v2578_v20, %v988_v16  ;;  %v1801_v16 = vld [vmem:[%s3143_s2 + $0x20] ss:$12 sps:$4 sm:$0xff]  }
 0x215   :  { %v1064_v5 = vpack.c.bf16 %v1026_v31, %v1024_v10  ;;  %v971_v9 = vpop.permute.xlu0 %970  ;;  %1152 = vmatpush1.bf16.msra.mxu1 %v1054_v63  ;;  %v1065_v52 = vpack.c.bf16 %v1027_v8, %v1025_v46 }
 0x216   :  { %v948_v47 = vpop.permute.xlu1 %947  ;;  %1153 = vmatprep.subr.bf16.mxu1 %v1057_v48  ;;  %v1061_v34 = vpack.c.bf16 %v994_v57, %v992_v0 }
 0x217   :  { %v953_v25 = vsel %vm949_vm11, %v2354_v62, %v948_v47  ;;  %v957_v43 = vsel %vm949_vm11, %v948_v47, %v2354_v62  ;;  %1182 = vmatprep.subr.bf16.mxu0 %v1065_v52  ;;  %v984_v62 = vsel %vm982_vm1, %v2402_v41, %v2426_v49  ;;  %v1797_v47 = vld [vmem:[%s3143_s2 + $0x8] ss:$12 sps:$4 sm:$0xff]  }
 0x218   :  { %v964_v51 = vmul.f32 %v2509_v12, %v953_v25  ;;  %v965_v56 = vmul.f32 %v2496_v7, %v957_v43  ;;  %1183 = vmatpush1.bf16.msra.mxu0 %v1064_v5  ;;  %v993_v40 = vmul.f32 %v2601_v18, %v984_v62  ;;  %v1794_v5 = vld [vmem:[%s3143_s2] ss:$12 sps:$4 sm:$0xff]  }
 0x219   :  { %v979_v29 = vpop.permute.xlu0 %978  ;;  %1154 = vmatpush1.bf16.msra.mxu1 %v1056_v24  ;;  %v1800_v24 = vld [vmem:[%s3143_s2 + $0x18] ss:$12 sps:$4 sm:$0xff]  }
 0x21a   :  { %v1006_v58 = vpop.permute.xlu1 %1005  ;;  %v1059_v11 = vpack.c.bf16 %v965_v56, %v963_v21  ;;  %v1058_v13 = vpack.c.bf16 %v964_v51, %v962_v14  ;;  %v985_v1 = vsel %vm982_vm1, %v971_v9, %v979_v29  ;;  %v989_v44 = vsel %vm982_vm1, %v979_v29, %v971_v9  ;;  %v1798_v9 = vld [vmem:[%s3143_s2 + $0x1c] ss:$12 sps:$4 sm:$0xff]  }
 0x21b   :  { %v1060_v3 = vpack.c.bf16 %v993_v40, %v991_v61  ;;  %v995_v33 = vmul.f32 %v2601_v18, %v985_v1  ;;  %v996_v59 = vmul.f32 %v2578_v20, %v989_v44  ;;  %v3170_v21 = vmov 0  }
 0x21c   :  { %1155 = vmatprep.subr.bf16.mxu1 %v1059_v11 }
 0x21d   :  { %v1004_v35 = vpop.permute.xlu0 %1003  ;;  %1156 = vmatpush1.bf16.msra.mxu1 %v1058_v13 }
 0x21e   :  { %v981_v41 = vpop.permute.xlu1 %980  ;;  %1157 = vmatprep.subr.bf16.mxu1 %v1061_v34 }
 0x21f   :  { %v986_v49 = vsel %vm982_vm1, %v973_v32, %v981_v41  ;;  %v990_v60 = vsel %vm982_vm1, %v981_v41, %v973_v32 }
 0x220   :  { %v997_v54 = vmul.f32 %v2601_v18, %v986_v49  ;;  %v998_v38 = vmul.f32 %v2578_v20, %v990_v60 }
 0x221   :  { %v1012_v37 = vpop.permute.xlu0 %1011  ;;  %1158 = vmatpush1.bf16.msra.mxu1 %v1060_v3 }
 0x222   :  { %v1018_v36 = vsel %vm1015_vm15, %v1004_v35, %v1012_v37  ;;  %v1022_v28 = vsel %vm1015_vm15, %v1012_v37, %v1004_v35  ;;  %v1014_v63 = vpop.permute.xlu1 %1013  ;;  %v1063_v31 = vpack.c.bf16 %v998_v38, %v996_v59  ;;  %v1062_v32 = vpack.c.bf16 %v997_v54, %v995_v33 }
 0x223   :  { %v1028_v8 = vmul.f32 %v2518_v23, %v1018_v36  ;;  %v1029_v10 = vmul.f32 %v2521_v42, %v1022_v28  ;;  %v1019_v46 = vsel %vm1015_vm15, %v1006_v58, %v1014_v63  ;;  %v1023_v27 = vsel %vm1015_vm15, %v1014_v63, %v1006_v58 }
 0x224   :  { %v1030_v48 = vmul.f32 %v2518_v23, %v1019_v46  ;;  %v1031_v50 = vmul.f32 %v2521_v42, %v1023_v27  ;;  %1159 = vmatprep.subr.bf16.mxu1 %v1063_v31 }
 0x225   :  { %1160 = vmatpush1.bf16.msra.mxu1 %v1062_v32 }
 0x226   :  { %v1066_v52 = vpack.c.bf16 %v1030_v48, %v1028_v8  ;;  %v1067_v14 = vpack.c.bf16 %v1031_v50, %v1029_v10 }
 0x228   :  { %1162 = vmatmul.mubr.bf16.vlgmr.msra.gmra.mrb[0].mxu1 %v1794_v5  ;;  %1184 = vmatprep.subr.bf16.mxu0 %v1067_v14 }
 0x229   :  { %1185 = vmatpush1.bf16.msra.mxu0 %v1066_v52  ;;  %1171 = vmatprep.mubr.bf16.mxu1 %v1798_v9 }
 0x22c   :  { %1693 = vmatmul.mubr.msk.bf16.vlgmr.msra.gmra.mrb[8].mxu0 %vm1122_vm2, %v1797_v47 }
 0x22d   :  { %1224 = vmatprep.mubr.bf16.mxu0 %v3170_v21 }
 0x230   :  { %1172 = vmatmul.mubr.bf16.gmra.mrb[4].mxu1 %v1800_v24 }
 0x232   :  { %v1075_v43 = vpop.permute.xlu0 %1074 }
 0x233   :  { %v1080_v62 = vpop.permute.xlu1 %1079 }
 0x234   :  { %1694 = vmatmul.mubr.msk.bf16.gmra.mrb[12].mxu0 %vm1122_vm2, %v1801_v16 }
 0x235   :  { %1637 = vmatprep.mubr.bf16.mxu0 %v3170_v21  ;;  %v1814_v21 = vmov 1983009808  }
 0x236   :  { %v1090_v37 = vpop.permute.xlu0 %1089  ;;  %v1545_v16 = vunpack.c.l.s4 %v1814_v21 }
 0x237   :  { %v1085_v33 = vpop.permute.xlu1 %1084 }
 0x2fb   :  { %v1163_v25 = vpop.f32.mrb[0].mxu1 }
 0x2fc   :  { %v1164_v45 = vadd.f32 %v1163_v25, %v1075_v43  ;;  %v1165_v0 = vpop.f32.mrb[1].mxu1  ;;  %v1546_v25 = vunpack.c.0.s8 %v1545_v16 }
 0x2fd   :  { %v1166_v51 = vadd.f32 %v1165_v0, %v1075_v43  ;;  %v1167_v56 = vpop.f32.mrb[2].mxu1 }
 0x2fe   :  { %v1169_v29 = vpop.f32.mrb[3].mxu1  ;;  %v1168_v58 = vadd.f32 %v1167_v56, %v1080_v62  ;;  %v1549_v43 = vsub.s32 %v1546_v25, %v1858_v4 }
 0x2ff   :  { %v1216_v57 = vpop.f32.mrb[8].mxu0  ;;  %v1170_v61 = vadd.f32 %v1169_v29, %v1080_v62 }
 0x300   :  { %v1217_v11 = vadd.f32 %v1216_v57, %v1164_v45  ;;  %v1218_v13 = vpop.f32.mrb[9].mxu0  ;;  %v1243_v45 = vld [vmem:[%s3145_s4] sm:$0x3f] }
 0x301   :  { %v1219_v34 = vadd.f32 %v1218_v13, %v1166_v51  ;;  %v1220_v40 = vpop.f32.mrb[10].mxu0  ;;  %v2787_v0 = vrot.slane %v1243_v45, %v1549_v43  ;;  %v1543_v4 = vcombine.high %v1243_v45, %v1243_v45 }
 0x302   :  { %v2653_v1 = vmax.f32 %v1217_v11, 0.0  ;;  %v1221_v44 = vadd.f32 %v1220_v40, %v1168_v58  ;;  %v1222_v35 = vpop.f32.mrb[11].mxu0 }
 0x303   :  { %v1223_v41 = vadd.f32 %v1222_v35, %v1170_v61  ;;  %v1173_v49 = vpop.f32.mrb[4].mxu1  ;;  %v2679_v5 = vmax.f32 %v1219_v34, 0.0  ;;  %3171 = vst [vmem:[#allocation3_spill] sm:$0xff] %v2787_v0  ;;  %v1558_v56 = vcombine.high %v2787_v0, %v2787_v0  ;;  %v2799_v57 = vrot.slane %v1543_v4, %v1549_v43  ;;  %v1536_v61 = vld [vmem:[%s3146_s5] sm:$0xf] }
 0x304   :  { %v2655_v60 = vmax.f32 %v1221_v44, 0.0  ;;  %v1175_v3 = vpop.f32.mrb[5].mxu1  ;;  %1244 = vrot.lane.b32.xlu1 %v2653_v1, %s1805_s0  ;;  %v1174_v54 = vadd.f32 %v1173_v49, %v1085_v33 }
 0x305   :  { %v1177_v59 = vpop.f32.mrb[6].mxu1  ;;  %v1176_v36 = vadd.f32 %v1175_v3, %v1085_v33  ;;  %v2683_v9 = vmax.f32 %v1223_v41, 0.0  ;;  %1596 = vmatprep.mubr.bf16.mxu1 %v1558_v56  ;;  %3172 = vst [vmem:[#allocation4_spill] sm:$0xff] %v2799_v57 }
 0x306   :  { %v1179_v38 = vpop.f32.mrb[7].mxu1  ;;  %1246 = vrot.lane.b32.xlu0 %v2655_v60, %s1805_s0  ;;  %v1178_v63 = vadd.f32 %v1177_v59, %v1090_v37 }
 0x307   :  { %v1226_v28 = vpop.f32.mrb[12].mxu0  ;;  %v1180_v8 = vadd.f32 %v1179_v38, %v1090_v37 }
 0x308   :  { %v1227_v31 = vadd.f32 %v1226_v28, %v1174_v54  ;;  %v1228_v32 = vpop.f32.mrb[13].mxu0  ;;  %1276 = vrot.lane.b32.xlu1 %v2653_v1, %s1806_s1 }
 0x309   :  { %v1229_v10 = vadd.f32 %v1228_v32, %v1176_v36  ;;  %v1230_v46 = vpop.f32.mrb[14].mxu0 }
 0x30a   :  { %v1231_v27 = vadd.f32 %v1230_v46, %v1178_v63  ;;  %v1232_v48 = vpop.f32.mrb[15].mxu0  ;;  %1278 = vrot.lane.b32.xlu0 %v2655_v60, %s1806_s1  ;;  %v2703_v52 = vmax.f32 %v1227_v31, 0.0 }
 0x30b   :  { %v1233_v50 = vadd.f32 %v1232_v48, %v1180_v8  ;;  %v2727_v47 = vmax.f32 %v1229_v10, 0.0 }
 0x30c   :  { %1308 = vrot.lane.b32.xlu1 %v2653_v1, %s1807_s7  ;;  %v2707_v14 = vmax.f32 %v1231_v27, 0.0 }
 0x30d   :  { %v2731_v24 = vmax.f32 %v1233_v50, 0.0 }
 0x30e   :  { %1310 = vrot.lane.b32.xlu0 %v2655_v60, %s1807_s7 }
 0x310   :  { %1340 = vrot.lane.b32.xlu1 %v2653_v1, %s1808_s8 }
 0x312   :  { %1342 = vrot.lane.b32.xlu0 %v2655_v60, %s1808_s8 }
 0x314   :  { %1372 = vrot.lane.b32.xlu1 %v2653_v1, %s1809_s9 }
 0x316   :  { %1374 = vrot.lane.b32.xlu0 %v2655_v60, %s1809_s9 }
 0x318   :  { %1404 = vrot.lane.b32.xlu1 %v2653_v1, %s1810_s10 }
 0x31a   :  { %1406 = vrot.lane.b32.xlu0 %v2655_v60, %s1810_s10 }
 0x31c   :  { %1252 = vrot.lane.b32.xlu1 %v2679_v5, %s1805_s0 }
 0x31e   :  { %1254 = vrot.lane.b32.xlu0 %v2683_v9, %s1805_s0 }
 0x320   :  { %1284 = vrot.lane.b32.xlu1 %v2679_v5, %s1806_s1 }
 0x322   :  { %1286 = vrot.lane.b32.xlu0 %v2683_v9, %s1806_s1 }
 0x324   :  { %1316 = vrot.lane.b32.xlu1 %v2679_v5, %s1807_s7 }
 0x326   :  { %1318 = vrot.lane.b32.xlu0 %v2683_v9, %s1807_s7 }
 0x328   :  { %1348 = vrot.lane.b32.xlu1 %v2679_v5, %s1808_s8 }
 0x32a   :  { %1350 = vrot.lane.b32.xlu0 %v2683_v9, %s1808_s8 }
 0x32c   :  { %1380 = vrot.lane.b32.xlu1 %v2679_v5, %s1809_s9 }
 0x32e   :  { %1382 = vrot.lane.b32.xlu0 %v2683_v9, %s1809_s9 }
 0x330   :  { %1248 = vrot.lane.b32.xlu1 %v2703_v52, %s1805_s0 }
 0x332   :  { %1250 = vrot.lane.b32.xlu0 %v2707_v14, %s1805_s0 }
 0x334   :  { %1280 = vrot.lane.b32.xlu1 %v2703_v52, %s1806_s1 }
 0x336   :  { %1282 = vrot.lane.b32.xlu0 %v2707_v14, %s1806_s1 }
 0x338   :  { %1312 = vrot.lane.b32.xlu1 %v2703_v52, %s1807_s7 }
 0x33a   :  { %1314 = vrot.lane.b32.xlu0 %v2707_v14, %s1807_s7 }
 0x33c   :  { %1344 = vrot.lane.b32.xlu1 %v2703_v52, %s1808_s8 }
 0x33e   :  { %1346 = vrot.lane.b32.xlu0 %v2707_v14, %s1808_s8 }
 0x340   :  { %1376 = vrot.lane.b32.xlu1 %v2703_v52, %s1809_s9 }
 0x342   :  { %1378 = vrot.lane.b32.xlu0 %v2707_v14, %s1809_s9 }
 0x344   :  { %1256 = vrot.lane.b32.xlu1 %v2727_v47, %s1805_s0 }
 0x346   :  { %1258 = vrot.lane.b32.xlu0 %v2731_v24, %s1805_s0 }
 0x348   :  { %1412 = vrot.lane.b32.xlu1 %v2679_v5, %s1810_s10 }
 0x34a   :  { %1414 = vrot.lane.b32.xlu0 %v2683_v9, %s1810_s10 }
 0x34c   :  { %1288 = vrot.lane.b32.xlu1 %v2727_v47, %s1806_s1 }
 0x34e   :  { %1290 = vrot.lane.b32.xlu0 %v2731_v24, %s1806_s1 }
 0x350   :  { %1320 = vrot.lane.b32.xlu1 %v2727_v47, %s1807_s7 }
 0x352   :  { %1410 = vrot.lane.b32.xlu0 %v2707_v14, %s1810_s10 }
 0x354   :  { %1352 = vrot.lane.b32.xlu1 %v2727_v47, %s1808_s8 }
 0x356   :  { %1322 = vrot.lane.b32.xlu0 %v2731_v24, %s1807_s7 }
 0x358   :  { %1384 = vrot.lane.b32.xlu1 %v2727_v47, %s1809_s9 }
 0x35a   :  { %1438 = vrot.lane.b32.xlu0 %v2655_v60, %s1811_s11 }
 0x35c   :  { %1408 = vrot.lane.b32.xlu1 %v2703_v52, %s1810_s10 }
 0x35e   :  { %1354 = vrot.lane.b32.xlu0 %v2731_v24, %s1808_s8 }
 0x360   :  { %1416 = vrot.lane.b32.xlu1 %v2727_v47, %s1810_s10 }
 0x362   :  { %1446 = vrot.lane.b32.xlu0 %v2683_v9, %s1811_s11 }
 0x364   :  { %1436 = vrot.lane.b32.xlu1 %v2653_v1, %s1811_s11 }
 0x366   :  { %1470 = vrot.lane.b32.xlu0 %v2655_v60, %s1812_s12 }
 0x368   :  { %1444 = vrot.lane.b32.xlu1 %v2679_v5, %s1811_s11 }
 0x36a   :  { %1478 = vrot.lane.b32.xlu0 %v2683_v9, %s1812_s12 }
 0x36c   :  { %1468 = vrot.lane.b32.xlu1 %v2653_v1, %s1812_s12 }
 0x36e   :  { %1386 = vrot.lane.b32.xlu0 %v2731_v24, %s1809_s9 }
 0x370   :  { %1476 = vrot.lane.b32.xlu1 %v2679_v5, %s1812_s12 }
 0x372   :  { %1442 = vrot.lane.b32.xlu0 %v2707_v14, %s1811_s11 }
 0x374   :  { %1440 = vrot.lane.b32.xlu1 %v2703_v52, %s1811_s11 }
 0x376   :  { %1418 = vrot.lane.b32.xlu0 %v2731_v24, %s1810_s10  ;;  %v1245_v51 = vpop.permute.xlu1 %1244 }
 0x378   :  { %v1247_v29 = vpop.permute.xlu0 %1246  ;;  %1448 = vrot.lane.b32.xlu1 %v2727_v47, %s1811_s11 }
 0x37a   :  { %1474 = vrot.lane.b32.xlu0 %v2707_v14, %s1812_s12  ;;  %v2797_v62 = vpop.permute.xlu1 %1276 }
 0x37c   :  { %v2801_v58 = vpop.permute.xlu0 %1278  ;;  %1472 = vrot.lane.b32.xlu1 %v2703_v52, %s1812_s12 }
 0x37e   :  { %1450 = vrot.lane.b32.xlu0 %v2731_v24, %s1811_s11  ;;  %v1309_v11 = vpop.permute.xlu1 %1308 }
 0x380   :  { %v1311_v13 = vpop.permute.xlu0 %1310  ;;  %1480 = vrot.lane.b32.xlu1 %v2727_v47, %s1812_s12 }
 0x382   :  { %1482 = vrot.lane.b32.xlu0 %v2731_v24, %s1812_s12  ;;  %v1341_v34 = vpop.permute.xlu1 %1340 }
 0x384   :  { %v1343_v40 = vpop.permute.xlu0 %1342  ;;  %1539 = vperm.xlu1 %1793, %v1536_v61  }
 0x386   :  { %v1373_v44 = vpop.permute.xlu1 %1372 }
 0x388   :  { %v1375_v35 = vpop.permute.xlu0 %1374 }
 0x38a   :  { %v2814_v41 = vpop.permute.xlu1 %1404 }
 0x38c   :  { %v2816_v49 = vpop.permute.xlu0 %1406 }
 0x38e   :  { %v1253_v3 = vpop.permute.xlu1 %1252 }
 0x38f   :  { %v1260_v33 = vsel %vm784_vm12, %v1245_v51, %v1253_v3  ;;  %v1264_v59 = vsel %vm784_vm12, %v1253_v3, %v1245_v51 }
 0x390   :  { %v1255_v54 = vpop.permute.xlu0 %1254  ;;  %v1268_v36 = vmul.f32 %v2229_v55, %v1264_v59  ;;  %v1269_v28 = vmul.f32 %v2224_v53, %v1260_v33 }
 0x391   :  { %v1261_v38 = vsel %vm784_vm12, %v1247_v29, %v1255_v54  ;;  %v1265_v37 = vsel %vm784_vm12, %v1255_v54, %v1247_v29 }
 0x392   :  { %v1270_v63 = vmul.f32 %v2229_v55, %v1265_v37  ;;  %v1271_v31 = vmul.f32 %v2224_v53, %v1261_v38  ;;  %v1285_v32 = vpop.permute.xlu1 %1284 }
 0x393   :  { %v1296_v8 = vsel %vm817_vm14, %v1285_v32, %v2797_v62 }
 0x394   :  { %v1500_v10 = vpack.c.bf16 %v1270_v63, %v1268_v36  ;;  %v1287_v46 = vpop.permute.xlu0 %1286  ;;  %v1501_v27 = vpack.c.bf16 %v1271_v31, %v1269_v28  ;;  %v2837_v50 = vmul.f32 %v2289_v2, %v1296_v8 }
 0x395   :  { %v1297_v48 = vsel %vm817_vm14, %v1287_v46, %v2801_v58 }
 0x396   :  { %v2840_v21 = vmul.f32 %v2289_v2, %v1297_v48  ;;  %1564 = vmatprep.subr.bf16.mxu1 %v1501_v27  ;;  %v1317_v16 = vpop.permute.xlu1 %1316 }
 0x397   :  { %v1324_v25 = vsel %vm850_vm0, %v1309_v11, %v1317_v16  ;;  %v1328_v43 = vsel %vm850_vm0, %v1317_v16, %v1309_v11  ;;  %1565 = vmatpush1.bf16.msra.mxu1 %v1500_v10 }
 0x398   :  { %v1319_v51 = vpop.permute.xlu0 %1318  ;;  %v2853_v4 = vmul.f32 %v2346_v19, %v1328_v43  ;;  %v2856_v61 = vmul.f32 %v2314_v17, %v1324_v25 }
 0x399   :  { %v1325_v56 = vsel %vm850_vm0, %v1311_v13, %v1319_v51  ;;  %v1329_v29 = vsel %vm850_vm0, %v1319_v51, %v1311_v13  ;;  %v1292_v13 = vsel %vm817_vm14, %v2797_v62, %v1285_v32 }
 0x39a   :  { %v2859_v3 = vmul.f32 %v2346_v19, %v1329_v29  ;;  %v2862_v11 = vmul.f32 %v2314_v17, %v1325_v56  ;;  %v1349_v33 = vpop.permute.xlu1 %1348  ;;  %v1301_v62 = vmul.f32 %v2257_v39, %v1292_v13 }
 0x39b   :  { %v1356_v59 = vsel %vm883_vm4, %v1341_v34, %v1349_v33  ;;  %v1360_v54 = vsel %vm883_vm4, %v1349_v33, %v1341_v34 }
 0x39c   :  { %v1351_v38 = vpop.permute.xlu0 %1350  ;;  %v2877_v63 = vmul.f32 %v2395_v26, %v1360_v54  ;;  %v2880_v31 = vmul.f32 %v2371_v22, %v1356_v59  ;;  %v1293_v54 = vsel %vm817_vm14, %v2801_v58, %v1287_v46 }
 0x39d   :  { %v1357_v36 = vsel %vm883_vm4, %v1343_v40, %v1351_v38  ;;  %v1361_v28 = vsel %vm883_vm4, %v1351_v38, %v1343_v40  ;;  %v1303_v45 = vmul.f32 %v2257_v39, %v1293_v54 }
 0x39e   :  { %v2883_v34 = vmul.f32 %v2395_v26, %v1361_v28  ;;  %v2886_v8 = vmul.f32 %v2371_v22, %v1357_v36  ;;  %v1381_v10 = vpop.permute.xlu1 %1380 }
 0x39f   :  { %v1388_v27 = vsel %vm916_vm5, %v1373_v44, %v1381_v10  ;;  %v1392_v48 = vsel %vm916_vm5, %v1381_v10, %v1373_v44 }
 0x3a0   :  { %v1383_v16 = vpop.permute.xlu0 %1382  ;;  %v2901_v56 = vmul.f32 %v2464_v6, %v1388_v27  ;;  %v2904_v29 = vmul.f32 %v2447_v15, %v1392_v48 }
 0x3a1   :  { %v1389_v43 = vsel %vm916_vm5, %v1375_v35, %v1383_v16  ;;  %v1393_v51 = vsel %vm916_vm5, %v1383_v16, %v1375_v35 }
 0x3a2   :  { %v2907_v44 = vmul.f32 %v2464_v6, %v1389_v43  ;;  %v2910_v33 = vmul.f32 %v2447_v15, %v1393_v51  ;;  %v1249_v59 = vpop.permute.xlu1 %1248 }
 0x3a4   :  { %v1251_v38 = vpop.permute.xlu0 %1250 }
 0x3a6   :  { %v1281_v36 = vpop.permute.xlu1 %1280 }
 0x3a8   :  { %v1283_v28 = vpop.permute.xlu0 %1282 }
 0x3aa   :  { %v1313_v10 = vpop.permute.xlu1 %1312 }
 0x3ac   :  { %v1315_v27 = vpop.permute.xlu0 %1314 }
 0x3ae   :  { %v2916_v48 = vpop.permute.xlu1 %1344 }
 0x3b0   :  { %v2918_v16 = vpop.permute.xlu0 %1346 }
 0x3b2   :  { %v2920_v43 = vpop.permute.xlu1 %1376 }
 0x3b4   :  { %v2922_v51 = vpop.permute.xlu0 %1378 }
 0x3b6   :  { %v1257_v40 = vpop.permute.xlu1 %1256 }
 0x3b7   :  { %v1262_v35 = vsel %vm784_vm12, %v1249_v59, %v1257_v40  ;;  %v1266_v25 = vsel %vm784_vm12, %v1257_v40, %v1249_v59 }
 0x3b8   :  { %v1259_v37 = vpop.permute.xlu0 %1258  ;;  %v1272_v46 = vmul.f32 %v2229_v55, %v1266_v25  ;;  %v1273_v0 = vmul.f32 %v2224_v53, %v1262_v35 }
 0x3b9   :  { %v1263_v57 = vsel %vm784_vm12, %v1251_v38, %v1259_v37  ;;  %v1267_v58 = vsel %vm784_vm12, %v1259_v37, %v1251_v38 }
 0x3ba   :  { %v1274_v18 = vmul.f32 %v2229_v55, %v1267_v58  ;;  %v1275_v40 = vmul.f32 %v2224_v53, %v1263_v57  ;;  %v1413_v59 = vpop.permute.xlu1 %1412  ;;  %v1505_v57 = vpack.c.bf16 %v1303_v45, %v1301_v62 }
 0x3bb   :  { %v1420_v32 = vsel %vm949_vm11, %v2814_v41, %v1413_v59  ;;  %v1424_v54 = vsel %vm949_vm11, %v1413_v59, %v2814_v41 }
 0x3bc   :  { %v1502_v37 = vpack.c.bf16 %v1274_v18, %v1272_v46  ;;  %v1415_v38 = vpop.permute.xlu0 %1414  ;;  %v1503_v25 = vpack.c.bf16 %v1275_v40, %v1273_v0  ;;  %v2957_v13 = vmul.f32 %v2509_v12, %v1420_v32  ;;  %v2960_v35 = vmul.f32 %v2496_v7, %v1424_v54 }
 0x3bd   :  { %v1421_v55 = vsel %vm949_vm11, %v2816_v49, %v1415_v38  ;;  %v1425_v53 = vsel %vm949_vm11, %v1415_v38, %v2816_v49 }
 0x3be   :  { %v2963_v41 = vmul.f32 %v2509_v12, %v1421_v55  ;;  %v2966_v18 = vmul.f32 %v2496_v7, %v1425_v53  ;;  %1566 = vmatprep.subr.bf16.mxu1 %v1503_v25  ;;  %v1289_v0 = vpop.permute.xlu1 %1288  ;;  %v3173_v25 = vpack.c.bf16 %v2840_v21, %v2837_v50 }
 0x3bf   :  { %v1294_v58 = vsel %vm817_vm14, %v1281_v36, %v1289_v0  ;;  %v1298_v49 = vsel %vm817_vm14, %v1289_v0, %v1281_v36  ;;  %1567 = vmatpush1.bf16.msra.mxu1 %v1502_v37 }
 0x3c0   :  { %v1524_v45 = vpack.c.bf16 %v2963_v41, %v2957_v13  ;;  %v1291_v46 = vpop.permute.xlu0 %1290  ;;  %1568 = vmatprep.subr.bf16.mxu1 %v1505_v57  ;;  %v1525_v40 = vpack.c.bf16 %v2966_v18, %v2960_v35  ;;  %v1304_v32 = vmul.f32 %v2289_v2, %v1298_v49  ;;  %v1305_v54 = vmul.f32 %v2257_v39, %v1294_v58 }
 0x3c1   :  { %v1295_v59 = vsel %vm817_vm14, %v1283_v28, %v1291_v46  ;;  %v1299_v62 = vsel %vm817_vm14, %v1291_v46, %v1283_v28 }
 0x3c2   :  { %v1306_v36 = vmul.f32 %v2289_v2, %v1299_v62  ;;  %v1307_v37 = vmul.f32 %v2257_v39, %v1295_v59  ;;  %v1321_v38 = vpop.permute.xlu1 %1320  ;;  %v3174_v39 = vpack.c.bf16 %v2862_v11, %v2856_v61 }
 0x3c3   :  { %1569 = vmatpush1.bf16.msra.mxu1 %v3173_v25  ;;  %v1326_v28 = vsel %vm850_vm0, %v1313_v10, %v1321_v38  ;;  %v1330_v58 = vsel %vm850_vm0, %v1321_v38, %v1313_v10 }
 0x3c4   :  { %v1506_v55 = vpack.c.bf16 %v1306_v36, %v1304_v32  ;;  %v2987_v53 = vpop.permute.xlu0 %1410  ;;  %v1507_v57 = vpack.c.bf16 %v1307_v37, %v1305_v54  ;;  %v1336_v49 = vmul.f32 %v2346_v19, %v1330_v58  ;;  %v1337_v46 = vmul.f32 %v2314_v17, %v1326_v28 }
 0x3c5   :  { %v3175_v32 = vpack.c.bf16 %v2859_v3, %v2853_v4  ;;  %v3176_v4 = vpack.c.bf16 %v2886_v8, %v2880_v31  ;;  %v3177_v31 = vpack.c.bf16 %v2883_v34, %v2877_v63  ;;  %v1519_v63 = vpack.c.bf16 %v2731_v24, %v2727_v47 }
 0x3c6   :  { %1570 = vmatprep.subr.bf16.mxu1 %v1507_v57  ;;  %v1353_v0 = vpop.permute.xlu1 %1352 }
 0x3c7   :  { %1571 = vmatpush1.bf16.msra.mxu1 %v1506_v55 }
 0x3c8   :  { %v1323_v2 = vpop.permute.xlu0 %1322  ;;  %1572 = vmatprep.subr.bf16.mxu1 %v3174_v39  ;;  %v1518_v39 = vpack.c.bf16 %v2707_v14, %v2703_v52  ;;  %v3178_v52 = vpack.c.bf16 %v2910_v33, %v2904_v29 }
 0x3c9   :  { %v1327_v50 = vsel %vm850_vm0, %v1315_v27, %v1323_v2  ;;  %v1331_v21 = vsel %vm850_vm0, %v1323_v2, %v1315_v27  ;;  %v1358_v27 = vsel %vm883_vm4, %v2916_v48, %v1353_v0 }
 0x3ca   :  { %v1338_v59 = vmul.f32 %v2346_v19, %v1331_v21  ;;  %v1339_v10 = vmul.f32 %v2314_v17, %v1327_v50  ;;  %v1385_v62 = vpop.permute.xlu1 %1384  ;;  %v1362_v19 = vsel %vm883_vm4, %v1353_v0, %v2916_v48  ;;  %v1369_v25 = vmul.f32 %v2371_v22, %v1358_v27 }
 0x3cb   :  { %1573 = vmatpush1.bf16.msra.mxu1 %v3175_v32  ;;  %v1368_v38 = vmul.f32 %v2395_v26, %v1362_v19 }
 0x3cc   :  { %v1510_v61 = vpack.c.bf16 %v1338_v59, %v1336_v49  ;;  %v3007_v11 = vpop.permute.xlu0 %1438  ;;  %v1511_v54 = vpack.c.bf16 %v1339_v10, %v1337_v46 }
 0x3ce   :  { %1574 = vmatprep.subr.bf16.mxu1 %v1511_v54  ;;  %v1409_v36 = vpop.permute.xlu1 %1408 }
 0x3cf   :  { %1575 = vmatpush1.bf16.msra.mxu1 %v1510_v61 }
 0x3d0   :  { %v1355_v17 = vpop.permute.xlu0 %1354  ;;  %1576 = vmatprep.subr.bf16.mxu1 %v3176_v4 }
 0x3d1   :  { %v1359_v3 = vsel %vm883_vm4, %v2918_v16, %v1355_v17  ;;  %v1363_v37 = vsel %vm883_vm4, %v1355_v17, %v2918_v16  ;;  %v1517_v16 = vpack.c.bf16 %v2683_v9, %v2679_v5  ;;  %v1390_v5 = vsel %vm916_vm5, %v2920_v43, %v1385_v62 }
 0x3d2   :  { %v1370_v48 = vmul.f32 %v2395_v26, %v1363_v37  ;;  %v1371_v55 = vmul.f32 %v2371_v22, %v1359_v3  ;;  %v1417_v57 = vpop.permute.xlu1 %1416  ;;  %v1516_v22 = vpack.c.bf16 %v2655_v60, %v2653_v1  ;;  %v1394_v9 = vsel %vm916_vm5, %v1385_v62, %v2920_v43 }
 0x3d3   :  { %1577 = vmatpush1.bf16.msra.mxu1 %v3177_v31  ;;  %v1400_v43 = vmul.f32 %v2464_v6, %v1390_v5  ;;  %v1401_v21 = vmul.f32 %v2447_v15, %v1394_v9  ;;  %v1422_v27 = vsel %vm949_vm11, %v1409_v36, %v1417_v57  ;;  %v1426_v19 = vsel %vm949_vm11, %v1417_v57, %v1409_v36 }
 0x3d4   :  { %v1514_v8 = vpack.c.bf16 %v1370_v48, %v1368_v38  ;;  %v3031_v0 = vpop.permute.xlu0 %1446  ;;  %v1515_v28 = vpack.c.bf16 %v1371_v55, %v1369_v25  ;;  %v1433_v38 = vmul.f32 %v2496_v7, %v1426_v19 }
 0x3d5   :  { %v1457_v36 = vsel %vm982_vm1, %v3031_v0, %v3007_v11 }
 0x3d6   :  { %1578 = vmatprep.subr.bf16.mxu1 %v1515_v28  ;;  %v1437_v58 = vpop.permute.xlu1 %1436  ;;  %v1463_v31 = vmul.f32 %v2578_v20, %v1457_v36 }
 0x3d7   :  { %1579 = vmatpush1.bf16.msra.mxu1 %v1514_v8 }
 0x3d8   :  { %v1471_v2 = vpop.permute.xlu0 %1470  ;;  %1580 = vmatprep.subr.bf16.mxu1 %v1517_v16  ;;  %v3180_v16 = vld [vmem:[#allocation2_spill] sm:$0xff] }
 0x3da   :  { %v1445_v26 = vpop.permute.xlu1 %1444 }
 0x3db   :  { %1581 = vmatpush1.bf16.msra.mxu1 %v1516_v22  ;;  %v1452_v35 = vsel %vm982_vm1, %v1437_v58, %v1445_v26 }
 0x3dc   :  { %v1479_v34 = vpop.permute.xlu0 %1478  ;;  %1582 = vmatprep.subr.bf16.mxu1 %v1519_v63 }
 0x3dd   :  { %v1485_v1 = vsel %vm1015_vm15, %v1471_v2, %v1479_v34  ;;  %v1489_v60 = vsel %vm1015_vm15, %v1479_v34, %v1471_v2  ;;  %v1460_v2 = vmul.f32 %v3180_v16, %v1452_v35 }
 0x3de   :  { %v1469_v50 = vpop.permute.xlu1 %1468  ;;  %v1494_v29 = vmul.f32 %v2518_v23, %v1485_v1  ;;  %v1495_v33 = vmul.f32 %v2521_v42, %v1489_v60 }
 0x3df   :  { %1583 = vmatpush1.bf16.msra.mxu1 %v1518_v39 }
 0x3e0   :  { %v1387_v47 = vpop.permute.xlu0 %1386  ;;  %1584 = vmatprep.subr.bf16.mxu1 %v3178_v52 }
 0x3e1   :  { %v1391_v14 = vsel %vm916_vm5, %v2922_v51, %v1387_v47  ;;  %v1395_v24 = vsel %vm916_vm5, %v1387_v47, %v2922_v51  ;;  %v3179_v51 = vpack.c.bf16 %v2907_v44, %v2901_v56  ;;  %v1456_v56 = vsel %vm982_vm1, %v1445_v26, %v1437_v58 }
 0x3e2   :  { %v1402_v49 = vmul.f32 %v2464_v6, %v1391_v14  ;;  %v1403_v46 = vmul.f32 %v2447_v15, %v1395_v24  ;;  %v1477_v59 = vpop.permute.xlu1 %1476  ;;  %v1432_v44 = vmul.f32 %v2509_v12, %v1422_v27  ;;  %v1461_v18 = vmul.f32 %v2578_v20, %v1456_v56 }
 0x3e3   :  { %v1484_v10 = vsel %vm1015_vm15, %v1469_v50, %v1477_v59  ;;  %v1488_v62 = vsel %vm1015_vm15, %v1477_v59, %v1469_v50  ;;  %1585 = vmatpush1.bf16.msra.mxu1 %v3179_v51 }
 0x3e4   :  { %v1522_v32 = vpack.c.bf16 %v1402_v49, %v1400_v43  ;;  %v1492_v6 = vmul.f32 %v2518_v23, %v1484_v10  ;;  %v1493_v15 = vmul.f32 %v2521_v42, %v1488_v62  ;;  %v1443_v61 = vpop.permute.xlu0 %1442  ;;  %v1523_v54 = vpack.c.bf16 %v1403_v46, %v1401_v21 }
 0x3e6   :  { %v1532_v17 = vpack.c.bf16 %v1494_v29, %v1492_v6  ;;  %v1441_v4 = vpop.permute.xlu1 %1440  ;;  %1586 = vmatprep.subr.bf16.mxu1 %v1523_v54  ;;  %v1533_v3 = vpack.c.bf16 %v1495_v33, %v1493_v15  ;;  %v3181_v29 = vld [vmem:[#allocation3_spill] sm:$0xff]  ;;  %v3182_v33 = vld [vmem:[#allocation4_spill] sm:$0xff] }
 0x3e7   :  { %1587 = vmatpush1.bf16.msra.mxu1 %v1522_v32 }
 0x3e8   :  { %v1419_v37 = vpop.permute.xlu0 %1418  ;;  %1588 = vmatprep.subr.bf16.mxu1 %v1525_v40  ;;  %1605 = vmatprep.subr.bf16.mxu0 %v1533_v3 }
 0x3e9   :  { %v1423_v25 = vsel %vm949_vm11, %v2987_v53, %v1419_v37  ;;  %v1427_v48 = vsel %vm949_vm11, %v1419_v37, %v2987_v53  ;;  %1606 = vmatpush1.bf16.msra.mxu0 %v1532_v17  ;;  %v1453_v53 = vsel %vm982_vm1, %v3007_v11, %v3031_v0 }
 0x3ea   :  { %v1434_v40 = vmul.f32 %v2509_v12, %v1423_v25  ;;  %v1435_v55 = vmul.f32 %v2496_v7, %v1427_v48  ;;  %v1449_v57 = vpop.permute.xlu1 %1448  ;;  %v1529_v7 = vpack.c.bf16 %v1463_v31, %v1461_v18  ;;  %v1462_v22 = vmul.f32 %v3180_v16, %v1453_v53 }
 0x3eb   :  { %1589 = vmatpush1.bf16.msra.mxu1 %v1524_v45  ;;  %v1454_v13 = vsel %vm982_vm1, %v1441_v4, %v1449_v57  ;;  %v1458_v41 = vsel %vm982_vm1, %v1449_v57, %v1441_v4 }
 0x3ec   :  { %v1526_v8 = vpack.c.bf16 %v1434_v40, %v1432_v44  ;;  %v1475_v28 = vpop.permute.xlu0 %1474  ;;  %v1527_v58 = vpack.c.bf16 %v1435_v55, %v1433_v38  ;;  %v1528_v11 = vpack.c.bf16 %v1462_v22, %v1460_v2  ;;  %v1464_v63 = vmul.f32 %v3180_v16, %v1454_v13 }
 0x3ed   :  { %v1465_v34 = vmul.f32 %v2578_v20, %v1458_v41 }
 0x3ee   :  { %v1473_v12 = vpop.permute.xlu1 %1472  ;;  %1590 = vmatprep.subr.bf16.mxu1 %v1527_v58 }
 0x3ef   :  { %1591 = vmatpush1.bf16.msra.mxu1 %v1526_v8 }
 0x3f0   :  { %v1451_v45 = vpop.permute.xlu0 %1450  ;;  %1592 = vmatprep.subr.bf16.mxu1 %v1529_v7 }
 0x3f1   :  { %v1455_v0 = vsel %vm982_vm1, %v1443_v61, %v1451_v45  ;;  %v1459_v26 = vsel %vm982_vm1, %v1451_v45, %v1443_v61 }
 0x3f2   :  { %v1466_v39 = vmul.f32 %v3180_v16, %v1455_v0  ;;  %v1467_v50 = vmul.f32 %v2578_v20, %v1459_v26  ;;  %v1481_v5 = vpop.permute.xlu1 %1480 }
 0x3f3   :  { %v1486_v9 = vsel %vm1015_vm15, %v1473_v12, %v1481_v5  ;;  %v1490_v1 = vsel %vm1015_vm15, %v1481_v5, %v1473_v12  ;;  %1593 = vmatpush1.bf16.msra.mxu1 %v1528_v11 }
 0x3f4   :  { %v1530_v60 = vpack.c.bf16 %v1466_v39, %v1464_v63  ;;  %v1483_v47 = vpop.permute.xlu0 %1482  ;;  %v1531_v52 = vpack.c.bf16 %v1467_v50, %v1465_v34  ;;  %v1496_v43 = vmul.f32 %v2518_v23, %v1486_v9  ;;  %v1497_v20 = vmul.f32 %v2521_v42, %v1490_v1 }
 0x3f5   :  { %v1487_v14 = vsel %vm1015_vm15, %v1475_v28, %v1483_v47  ;;  %v1491_v24 = vsel %vm1015_vm15, %v1483_v47, %v1475_v28 }
 0x3f6   :  { %v1498_v21 = vmul.f32 %v2518_v23, %v1487_v14  ;;  %v1499_v49 = vmul.f32 %v2521_v42, %v1491_v24  ;;  %1594 = vmatprep.subr.bf16.mxu1 %v1531_v52 }
 0x3f7   :  { %1595 = vmatpush1.bf16.msra.mxu1 %v1530_v60 }
 0x3f8   :  { %v1534_v46 = vpack.c.bf16 %v1498_v21, %v1496_v43  ;;  %v1535_v59 = vpack.c.bf16 %v1499_v49, %v1497_v20 }
 0x3fa   :  { %1597 = vmatmul.mubr.bf16.vlgmr.msra.gmra.mrb[8].mxu1 %v3181_v29  ;;  %1607 = vmatprep.subr.bf16.mxu0 %v1535_v59 }
 0x3fb   :  { %1608 = vmatpush1.bf16.msra.mxu0 %v1534_v46 }
 0x3fe   :  { %1695 = vmatmul.mubr.msk.bf16.vlgmr.msra.gmra.mrb[16].mxu0 %vm1122_vm2, %v3182_v33 }
 0x403   :  { %v1540_v62 = vpop.permute.xlu1 %1539 }
 0x4cd   :  { %v1598_v30 = vpop.f32.mrb[8].mxu1 }
 0x4ce   :  { %v1600_v10 = vpop.f32.mrb[9].mxu1  ;;  %v1599_v32 = vadd.f32 %v1598_v30, %v1540_v62 }
 0x4cf   :  { %v1602_v51 = vpop.f32.mrb[10].mxu1  ;;  %v1601_v23 = vadd.f32 %v1600_v10, %v1540_v62 }
 0x4d0   :  { %v1603_v6 = vpop.f32.mrb[11].mxu1 }
 0x4d1   :  { %v1639_v15 = vpop.f32.mrb[16].mxu0 }
 0x4d2   :  { %v1640_v42 = vadd.f32 %v1639_v15, %v1599_v32  ;;  %v1641_v61 = vpop.f32.mrb[17].mxu0 }
 0x4d3   :  { %v1642_v54 = vadd.f32 %v1641_v61, %v1601_v23  ;;  %v1643_v27 = vpop.f32.mrb[18].mxu0 }
 0x4d4   :  { %v1644_v19 = vpop.f32.mrb[19].mxu0 }
 0x4d5   :  { %v1648_v17 = vcombine.low %v1640_v42, %v1642_v54 }
 0x4d7   :  { %1650 = vst [vmem:[%s3147_s6] sm:$0xff] %v1648_v17 }

</bundles_post_ra>
